<compile_context>
chip_gen: v6e
topology: v6e:2x2x1
jax: 0.10.0
libtpu: 0.0.40
codegen_flags: <defaults>
</compile_context>

<pallas_src>
import functools

import jax
import jax.numpy as jnp
from jax.experimental import pallas as pl
from jax.experimental.pallas import tpu as pltpu

LN_EPS = 1e-5


def _layernorm(y, gamma, beta):
    mean = jnp.mean(y, axis=-1, keepdims=True)
    var = jnp.mean((y - mean) ** 2, axis=-1, keepdims=True)
    return (y - mean) * jax.lax.rsqrt(var + LN_EPS) * gamma + beta


# ----------------------------- fused kernel ----------------------------------
def fused_kernel(x_ref, mask_ref, amaskT_ref, posT_ref, rep_ref,
                 wt_ref, rows_ref, wqkv_ref, bqkv_ref, wo_ref,
                 w1abT_ref, w1cT_ref, w2T_ref, b2col_ref,
                 o_ref, *, num_heads):
    x = x_ref[...]                                   # (B*S, D) whole batch
    BS, D = x.shape
    SS = posT_ref.shape[-1]                          # S*S
    BSS = rep_ref.shape[-1]                          # B*S*S
    nb = BSS // SS                                   # batch size (static)
    rows = rows_ref[...]                             # (6, D): b_t,g_t,beta_t,b_o,g_a,beta_a

    # ---- 1) transform: Linear -> ReLU -> LayerNorm --------------------------
    y = jnp.dot(x, wt_ref[...], preferred_element_type=jnp.float32) + rows[0:1]
    y = jnp.maximum(y, 0.0)
    y = _layernorm(y, rows[1:2], rows[2:3])

    # ---- 2) multi-head attention (whole batch in one set of matmuls) --------
    Hdh = wqkv_ref.shape[-1] // 3
    dh = Hdh // num_heads
    scale = 1.0 / (dh ** 0.5)
    mask_add = mask_ref[...]                         # (B*S, B*S) additive mask

    qkv = jnp.dot(y, wqkv_ref[...], preferred_element_type=jnp.float32) + bqkv_ref[...]
    w_o = wo_ref[...]                                # (H*dh, D)
    attn = jnp.zeros((BS, D), jnp.float32) + rows[3:4]          # start from b_o
    for hh in range(num_heads):
        lo = hh * dh
        q_h = qkv[:, lo:lo + dh]
        k_h = qkv[:, Hdh + lo:Hdh + lo + dh]
        v_h = qkv[:, 2 * Hdh + lo:2 * Hdh + lo + dh]
        s = jax.lax.dot_general(q_h, k_h, (((1,), (1,)), ((), ())),
                                preferred_element_type=jnp.float32) * scale + mask_add
        s = s - jnp.max(s, axis=-1, keepdims=True)
        p = jnp.exp(s)
        p = p / jnp.sum(p, axis=-1, keepdims=True)
        ctx_h = jnp.dot(p, v_h, preferred_element_type=jnp.float32)        # (B*S, dh)
        # per-head output-projection accumulate (sublane slice of w_o is free)
        attn = attn + jnp.dot(ctx_h, w_o[lo:lo + dh, :],
                              preferred_element_type=jnp.float32)
    h = _layernorm(attn, rows[4:5], rows[5:6])       # (B*S, D)

    # ---- 3) pairwise classifier, transposed => lane-dense (C, B*S*S) output -
    # abT = [w1a^T ; w1b^T] @ h^T, done as an A @ B^T dot_general (no explicit
    # transpose materialized).
    abT = jax.lax.dot_general(w1abT_ref[...], h, (((1,), (1,)), ((), ())),
                              preferred_element_type=jnp.float32)          # (2*HD, B*S)
    HD = abT.shape[0] // 2
    # rel-pos term; b1 is folded in via the ones-row appended to posT.
    ppT = jnp.dot(w1cT_ref[...], posT_ref[...],
                  preferred_element_type=jnp.float32)                      # (HD, S*S)
    ppT_all = jnp.concatenate([ppT] * nb, axis=-1)                         # (HD, B*S*S)

    rep = rep_ref[...]                               # (2*B*S, B*S*S) one-hot replication
    hidT = jnp.maximum(
        jnp.dot(abT[:HD], rep[:BS], preferred_element_type=jnp.float32)
        + jnp.dot(abT[HD:], rep[BS:], preferred_element_type=jnp.float32)
        + ppT_all, 0.0)                                                    # (HD, B*S*S)
    logitsT = jnp.dot(w2T_ref[...], hidT,
                      preferred_element_type=jnp.float32) + b2col_ref[...] # (C, B*S*S)
    o_ref[...] = logitsT * amaskT_ref[...]           # full-width 128-lane stores


# -------------------------------- wrapper -------------------------------------
def relation_classifier_forward(params, x, entity_labels, attention_mask,
                                sentence_mask, *, num_heads, max_seq_len):
    B, S, _ = x.shape
    ent = params["ent_emb"][entity_labels]                               # (B,S,E)
    combined = jnp.concatenate([x, ent], axis=-1).astype(jnp.float32)    # (B,S,D)
    D = combined.shape[-1]
    BS, SS, BSS = B * S, S * S, B * S * S
    xin = combined.reshape(BS, D)

    # fused QKV / output-projection weight slabs
    H, dh = params["w_q"].shape[0], params["w_q"].shape[-1]
    Hdh = H * dh
    w_qkv = jnp.concatenate([
        params["w_q"].transpose(1, 0, 2).reshape(D, Hdh),
        params["w_k"].transpose(1, 0, 2).reshape(D, Hdh),
        params["w_v"].transpose(1, 0, 2).reshape(D, Hdh)], axis=-1)      # (D, 3*H*dh)
    b_qkv = jnp.concatenate([
        params["b_q"].reshape(1, Hdh),
        params["b_k"].reshape(1, Hdh),
        params["b_v"].reshape(1, Hdh)], axis=-1)                         # (1, 3*H*dh)
    w_o = params["w_o"].reshape(Hdh, D)                                  # (H*dh, D)

    # nine 1-row params -> one (6, D) slab (b1/b2 folded elsewhere, b_qkv separate width)
    rows = jnp.concatenate([params["b_t"], params["g_t"], params["beta_t"],
                            params["b_o"], params["g_a"], params["beta_a"]], axis=0)

    # whole-batch additive attention mask: per-batch 0/1 float blocks on the
    # diagonal (PyTorch float attn_mask semantics), -1e9 cross-batch.
    smf = sentence_mask.astype(jnp.float32)
    bidx = jnp.arange(B)
    mask_big = jnp.full((B, S, B, S), -1e9, jnp.float32)
    mask_big = mask_big.at[bidx, :, bidx, :].set(smf).reshape(BS, BS)

    # lane-dense flat pair mask (1, B*S*S)
    amaskT = attention_mask.astype(jnp.float32).reshape(1, BSS)

    # relative-position gather, transposed, ones-row appended so b1 folds into w1c
    idx = jnp.arange(S)[:, None] - jnp.arange(S)[None, :] + max_seq_len - 1
    posT = params["rel_pos_table"][idx].reshape(SS, -1).T                # (P2, S*S)
    posT_aug = jnp.concatenate([posT, jnp.ones((1, SS), jnp.float32)], axis=0)

    HD = params["w1a"].shape[-1]
    C = params["w2"].shape[-1]
    w1abT = jnp.concatenate([params["w1a"].T, params["w1b"].T], axis=0)      # (2*HD, D)
    w1cT_aug = jnp.concatenate([params["w1c"].T, params["b1"].T], axis=-1)   # (HD, P2+1)
    w2T = params["w2"].T                                                     # (C, HD)
    b2col = params["b2"].T                                                   # (C, 1)

    # one-hot replication matrices (grid-invariant -> built once here):
    # flat pair f = b*S*S + i*S + j selects token rows b*S+i and b*S+j.
    f = jnp.arange(BSS)
    rows_i = (f // SS) * S + (f // S) % S
    rows_j = (f // SS) * S + f % S
    r = jnp.arange(BS)[:, None]
    rep = jnp.concatenate([(r == rows_i[None, :]).astype(jnp.float32),
                           (r == rows_j[None, :]).astype(jnp.float32)], axis=0)

    vmem = lambda: pl.BlockSpec(memory_space=pltpu.MemorySpace.VMEM)
    # Single grid-less invocation: every operand is a whole-array VMEM block.
    # (If B grows on v7x, switch to grid=(B,) + dimension_semantics=("parallel",).)
    outT = pl.pallas_call(
        functools.partial(fused_kernel, num_heads=num_heads),
        out_shape=jax.ShapeDtypeStruct((C, BSS), jnp.float32),
        in_specs=[vmem() for _ in range(14)],
        out_specs=vmem(),
    )(xin, mask_big, amaskT, posT_aug, rep,
      params["w_t"], rows, w_qkv, b_qkv, w_o,
      w1abT, w1cT_aug, w2T, b2col)

    # (C, B*S*S) lane-dense kernel output -> (B, S, S, C)
    return jnp.transpose(outT.reshape(C, B, S, S), (1, 2, 3, 0))


# ---------------------------- pure-JAX reference ------------------------------
def reference_forward(params, x, entity_labels, attention_mask, sentence_mask,
                      *, num_heads, max_seq_len):
    ent = params["ent_emb"][entity_labels]
    combined = jnp.concatenate([x, ent], axis=-1).astype(jnp.float32)
    B, S, D = combined.shape
    y = jnp.maximum(combined @ params["w_t"] + params["b_t"][0], 0.0)
    y = _layernorm(y, params["g_t"][0], params["beta_t"][0])

    dh = params["w_q"].shape[-1]
    q = jnp.einsum("bsd,hde->bhse", y, params["w_q"]) + params["b_q"][None]
    k = jnp.einsum("bsd,hde->bhse", y, params["w_k"]) + params["b_k"][None]
    v = jnp.einsum("bsd,hde->bhse", y, params["w_v"]) + params["b_v"][None]
    scores = jnp.einsum("bhqe,bhke->bhqk", q, k) / jnp.sqrt(jnp.float32(dh))
    scores = scores + sentence_mask.astype(jnp.float32)[:, None, :, :]
    p = jax.nn.softmax(scores, axis=-1)
    ctx = jnp.einsum("bhqk,bhke->bhqe", p, v)
    attn_out = jnp.einsum("bhqe,hed->bqd", ctx, params["w_o"]) + params["b_o"][0]
    out = _layernorm(attn_out, params["g_a"][0], params["beta_a"][0])

    idx = jnp.arange(S)[:, None] - jnp.arange(S)[None, :] + max_seq_len - 1
    rel_pos = params["rel_pos_table"][idx]
    a = out @ params["w1a"]
    bj = out @ params["w1b"]
    pp = rel_pos @ params["w1c"]
    hid = jnp.maximum(a[:, :, None, :] + bj[:, None, :, :] + pp[None]
                      + params["b1"][0], 0.0)
    o = hid @ params["w2"] + params["b2"][0]
    return o * attention_mask[..., None].astype(jnp.float32)


if __name__ == "__main__":
    B, S = 2, 16
    input_dim, embedding_dim = 24, 8
    num_entity_types = 7
    num_heads = 4
    hidden_dim = 32
    max_seq_len = 32
    pos_dim = 10
    num_classes = 5
    D = input_dim + embedding_dim
    dh = D // num_heads
    P2 = 2 * pos_dim

    key = jax.random.PRNGKey(0)
    ks = jax.random.split(key, 24)
    init = lambda k, shape, s: jax.random.normal(k, shape, jnp.float32) * s

    params = {
        "ent_emb": init(ks[0], (num_entity_types, embedding_dim), 0.5),
        "w_t": init(ks[1], (D, D), 0.15),
        "b_t": init(ks[2], (1, D), 0.1),
        "g_t": jnp.ones((1, D), jnp.float32),
        "beta_t": jnp.zeros((1, D), jnp.float32),
        "w_q": init(ks[3], (num_heads, D, dh), 0.15),
        "w_k": init(ks[4], (num_heads, D, dh), 0.15),
        "w_v": init(ks[5], (num_heads, D, dh), 0.15),
        "b_q": init(ks[6], (num_heads, 1, dh), 0.1),
        "b_k": init(ks[7], (num_heads, 1, dh), 0.1),
        "b_v": init(ks[8], (num_heads, 1, dh), 0.1),
        "w_o": init(ks[9], (num_heads, dh, D), 0.15),
        "b_o": init(ks[10], (1, D), 0.1),
        "g_a": jnp.ones((1, D), jnp.float32),
        "beta_a": jnp.zeros((1, D), jnp.float32),
        "rel_pos_table": init(ks[11], (2 * max_seq_len - 1, P2), 0.3),
        "w1a": init(ks[12], (D, hidden_dim), 0.15),
        "w1b": init(ks[13], (D, hidden_dim), 0.15),
        "w1c": init(ks[14], (P2, hidden_dim), 0.15),
        "b1": init(ks[15], (1, hidden_dim), 0.1),
        "w2": init(ks[16], (hidden_dim, num_classes), 0.15),
        "b2": init(ks[17], (1, num_classes), 0.1),
    }

    x = jax.random.normal(ks[18], (B, S, input_dim), jnp.float32)
    entity_labels = jax.random.randint(ks[19], (B, S), 0, num_entity_types)
    attention_mask = (jax.random.uniform(ks[20], (B, S, S)) > 0.3).astype(jnp.int32)
    sentence_mask = (jax.random.uniform(ks[21], (B, S, S)) > 0.2).astype(jnp.int32)

    fwd = jax.jit(functools.partial(relation_classifier_forward,
                                    num_heads=num_heads, max_seq_len=max_seq_len))
    out = fwd(params, x, entity_labels, attention_mask, sentence_mask)
    out = jax.block_until_ready(out)

    ref = reference_forward(params, x, entity_labels, attention_mask,
                            sentence_mask, num_heads=num_heads,
                            max_seq_len=max_seq_len)
    assert out.shape == (B, S, S, num_classes)
    assert jnp.allclose(out, ref, atol=2e-2, rtol=2e-2)
    print("KERNEL_OK")
</pallas_src>

<mosaic_0001>
module attributes {stable_mosaic.version = 11 : i64} {
  func.func @fused_kernel(%arg0: memref<32x32xf32, #tpu.memory_space<vmem>>, %arg1: memref<32x32xf32, #tpu.memory_space<vmem>>, %arg2: memref<1x512xf32, #tpu.memory_space<vmem>>, %arg3: memref<21x256xf32, #tpu.memory_space<vmem>>, %arg4: memref<64x512xf32, #tpu.memory_space<vmem>>, %arg5: memref<32x32xf32, #tpu.memory_space<vmem>>, %arg6: memref<6x32xf32, #tpu.memory_space<vmem>>, %arg7: memref<32x96xf32, #tpu.memory_space<vmem>>, %arg8: memref<1x96xf32, #tpu.memory_space<vmem>>, %arg9: memref<32x32xf32, #tpu.memory_space<vmem>>, %arg10: memref<64x32xf32, #tpu.memory_space<vmem>>, %arg11: memref<32x21xf32, #tpu.memory_space<vmem>>, %arg12: memref<5x32xf32, #tpu.memory_space<vmem>>, %arg13: memref<5x1xf32, #tpu.memory_space<vmem>>, %arg14: memref<5x512xf32, #tpu.memory_space<vmem>>) attributes {dimension_semantics = [], scalar_prefetch = 0 : i64, scratch_operands = 0 : i64, tpu.core_type = #tpu.core_type<tc>} {
    %c0 = arith.constant 0 : index
    %c0_0 = arith.constant 0 : index
    %0 = vector.load %arg0[%c0, %c0_0] : memref<32x32xf32, #tpu.memory_space<vmem>>, vector<32x32xf32>
    %c0_1 = arith.constant 0 : index
    %c0_2 = arith.constant 0 : index
    %1 = vector.load %arg6[%c0_1, %c0_2] : memref<6x32xf32, #tpu.memory_space<vmem>>, vector<6x32xf32>
    %c0_3 = arith.constant 0 : index
    %c0_4 = arith.constant 0 : index
    %2 = vector.load %arg5[%c0_3, %c0_4] : memref<32x32xf32, #tpu.memory_space<vmem>>, vector<32x32xf32>
    %cst = arith.constant dense<0.000000e+00> : vector<32x32xf32>
    %3 = tpu.matmul %0, %2, %cst {dimension_numbers = #tpu.dot_dimension_numbers<[1], [0], [0], [1], [0, 0, 1, 1], [], []>} : vector<32x32xf32>, vector<32x32xf32>, vector<32x32xf32> -> vector<32x32xf32>
    %4 = vector.extract_strided_slice %1 {offsets = [0, 0], sizes = [1, 32], strides = [1, 1]} : vector<6x32xf32> to vector<1x32xf32>
    %5 = vector.broadcast %4 : vector<1x32xf32> to vector<32x32xf32>
    %6 = arith.addf %3, %5 : vector<32x32xf32>
    %cst_5 = arith.constant 0.000000e+00 : f32
    %7 = vector.broadcast %cst_5 : f32 to vector<32x32xf32>
    %8 = arith.maximumf %6, %7 : vector<32x32xf32>
    %9 = vector.extract_strided_slice %1 {offsets = [1, 0], sizes = [1, 32], strides = [1, 1]} : vector<6x32xf32> to vector<1x32xf32>
    %10 = vector.extract_strided_slice %1 {offsets = [2, 0], sizes = [1, 32], strides = [1, 1]} : vector<6x32xf32> to vector<1x32xf32>
    %cst_6 = arith.constant dense<0.000000e+00> : vector<32xf32>
    %11 = vector.multi_reduction <add>, %8, %cst_6 [1] : vector<32x32xf32> to vector<32xf32>
    %12 = vector.shape_cast %11 : vector<32xf32> to vector<32x1xf32>
    %cst_7 = arith.constant 3.200000e+01 : f32
    %13 = vector.broadcast %cst_7 : f32 to vector<32x1xf32>
    %14 = arith.divf %12, %13 : vector<32x1xf32>
    %15 = vector.broadcast %14 : vector<32x1xf32> to vector<32x32xf32>
    %16 = arith.subf %8, %15 : vector<32x32xf32>
    %17 = arith.mulf %16, %16 : vector<32x32xf32>
    %cst_8 = arith.constant dense<0.000000e+00> : vector<32xf32>
    %18 = vector.multi_reduction <add>, %17, %cst_8 [1] : vector<32x32xf32> to vector<32xf32>
    %19 = vector.shape_cast %18 : vector<32xf32> to vector<32x1xf32>
    %cst_9 = arith.constant 3.200000e+01 : f32
    %20 = vector.broadcast %cst_9 : f32 to vector<32x1xf32>
    %21 = arith.divf %19, %20 : vector<32x1xf32>
    %22 = vector.broadcast %14 : vector<32x1xf32> to vector<32x32xf32>
    %23 = arith.subf %8, %22 : vector<32x32xf32>
    %cst_10 = arith.constant 9.99999974E-6 : f32
    %24 = vector.broadcast %cst_10 : f32 to vector<32x1xf32>
    %25 = arith.addf %21, %24 : vector<32x1xf32>
    %26 = math.rsqrt %25 : vector<32x1xf32>
    %27 = vector.broadcast %26 : vector<32x1xf32> to vector<32x32xf32>
    %28 = arith.mulf %23, %27 : vector<32x32xf32>
    %29 = vector.broadcast %9 : vector<1x32xf32> to vector<32x32xf32>
    %30 = arith.mulf %28, %29 : vector<32x32xf32>
    %31 = vector.broadcast %10 : vector<1x32xf32> to vector<32x32xf32>
    %32 = arith.addf %30, %31 : vector<32x32xf32>
    %c0_11 = arith.constant 0 : index
    %c0_12 = arith.constant 0 : index
    %33 = vector.load %arg1[%c0_11, %c0_12] : memref<32x32xf32, #tpu.memory_space<vmem>>, vector<32x32xf32>
    %c0_13 = arith.constant 0 : index
    %c0_14 = arith.constant 0 : index
    %34 = vector.load %arg7[%c0_13, %c0_14] : memref<32x96xf32, #tpu.memory_space<vmem>>, vector<32x96xf32>
    %cst_15 = arith.constant dense<0.000000e+00> : vector<32x96xf32>
    %35 = tpu.matmul %32, %34, %cst_15 {dimension_numbers = #tpu.dot_dimension_numbers<[1], [0], [0], [1], [0, 0, 1, 1], [], []>} : vector<32x32xf32>, vector<32x96xf32>, vector<32x96xf32> -> vector<32x96xf32>
    %c0_16 = arith.constant 0 : index
    %c0_17 = arith.constant 0 : index
    %36 = vector.load %arg8[%c0_16, %c0_17] : memref<1x96xf32, #tpu.memory_space<vmem>>, vector<1x96xf32>
    %37 = vector.broadcast %36 : vector<1x96xf32> to vector<32x96xf32>
    %38 = arith.addf %35, %37 : vector<32x96xf32>
    %c0_18 = arith.constant 0 : index
    %c0_19 = arith.constant 0 : index
    %39 = vector.load %arg9[%c0_18, %c0_19] : memref<32x32xf32, #tpu.memory_space<vmem>>, vector<32x32xf32>
    %cst_20 = arith.constant 0.000000e+00 : f32
    %40 = vector.broadcast %cst_20 : f32 to vector<32x32xf32>
    %41 = vector.extract_strided_slice %1 {offsets = [3, 0], sizes = [1, 32], strides = [1, 1]} : vector<6x32xf32> to vector<1x32xf32>
    %42 = vector.broadcast %41 : vector<1x32xf32> to vector<32x32xf32>
    %43 = arith.addf %40, %42 : vector<32x32xf32>
    %44 = vector.extract_strided_slice %38 {offsets = [0, 0], sizes = [32, 8], strides = [1, 1]} : vector<32x96xf32> to vector<32x8xf32>
    %45 = vector.extract_strided_slice %38 {offsets = [0, 32], sizes = [32, 8], strides = [1, 1]} : vector<32x96xf32> to vector<32x8xf32>
    %46 = vector.extract_strided_slice %38 {offsets = [0, 64], sizes = [32, 8], strides = [1, 1]} : vector<32x96xf32> to vector<32x8xf32>
    %cst_21 = arith.constant dense<0.000000e+00> : vector<32x32xf32>
    %47 = tpu.matmul %44, %45, %cst_21 {dimension_numbers = #tpu.dot_dimension_numbers<[1], [1], [0], [0], [0, 0, 1, 0], [], []>} : vector<32x8xf32>, vector<32x8xf32>, vector<32x32xf32> -> vector<32x32xf32>
    %cst_22 = arith.constant 0.353553385 : f32
    %48 = vector.broadcast %cst_22 : f32 to vector<32x32xf32>
    %49 = arith.mulf %47, %48 : vector<32x32xf32>
    %50 = arith.addf %49, %33 : vector<32x32xf32>
    %cst_23 = arith.constant dense<0xFF800000> : vector<32xf32>
    %51 = vector.multi_reduction <maximumf>, %50, %cst_23 [1] : vector<32x32xf32> to vector<32xf32>
    %52 = vector.shape_cast %51 : vector<32xf32> to vector<32x1xf32>
    %53 = vector.broadcast %52 : vector<32x1xf32> to vector<32x32xf32>
    %54 = arith.subf %50, %53 : vector<32x32xf32>
    %55 = math.exp %54 : vector<32x32xf32>
    %cst_24 = arith.constant dense<0.000000e+00> : vector<32xf32>
    %56 = vector.multi_reduction <add>, %55, %cst_24 [1] : vector<32x32xf32> to vector<32xf32>
    %57 = vector.shape_cast %56 : vector<32xf32> to vector<32x1xf32>
    %58 = vector.broadcast %57 : vector<32x1xf32> to vector<32x32xf32>
    %59 = arith.divf %55, %58 : vector<32x32xf32>
    %cst_25 = arith.constant dense<0.000000e+00> : vector<32x8xf32>
    %60 = tpu.matmul %59, %46, %cst_25 {dimension_numbers = #tpu.dot_dimension_numbers<[1], [0], [0], [1], [0, 0, 1, 1], [], []>} : vector<32x32xf32>, vector<32x8xf32>, vector<32x8xf32> -> vector<32x8xf32>
    %61 = vector.extract_strided_slice %39 {offsets = [0, 0], sizes = [8, 32], strides = [1, 1]} : vector<32x32xf32> to vector<8x32xf32>
    %cst_26 = arith.constant dense<0.000000e+00> : vector<32x32xf32>
    %62 = tpu.matmul %60, %61, %cst_26 {dimension_numbers = #tpu.dot_dimension_numbers<[1], [0], [0], [1], [0, 0, 1, 1], [], []>} : vector<32x8xf32>, vector<8x32xf32>, vector<32x32xf32> -> vector<32x32xf32>
    %63 = arith.addf %43, %62 : vector<32x32xf32>
    %64 = vector.extract_strided_slice %38 {offsets = [0, 8], sizes = [32, 8], strides = [1, 1]} : vector<32x96xf32> to vector<32x8xf32>
    %65 = vector.extract_strided_slice %38 {offsets = [0, 40], sizes = [32, 8], strides = [1, 1]} : vector<32x96xf32> to vector<32x8xf32>
    %66 = vector.extract_strided_slice %38 {offsets = [0, 72], sizes = [32, 8], strides = [1, 1]} : vector<32x96xf32> to vector<32x8xf32>
    %cst_27 = arith.constant dense<0.000000e+00> : vector<32x32xf32>
    %67 = tpu.matmul %64, %65, %cst_27 {dimension_numbers = #tpu.dot_dimension_numbers<[1], [1], [0], [0], [0, 0, 1, 0], [], []>} : vector<32x8xf32>, vector<32x8xf32>, vector<32x32xf32> -> vector<32x32xf32>
    %cst_28 = arith.constant 0.353553385 : f32
    %68 = vector.broadcast %cst_28 : f32 to vector<32x32xf32>
    %69 = arith.mulf %67, %68 : vector<32x32xf32>
    %70 = arith.addf %69, %33 : vector<32x32xf32>
    %cst_29 = arith.constant dense<0xFF800000> : vector<32xf32>
    %71 = vector.multi_reduction <maximumf>, %70, %cst_29 [1] : vector<32x32xf32> to vector<32xf32>
    %72 = vector.shape_cast %71 : vector<32xf32> to vector<32x1xf32>
    %73 = vector.broadcast %72 : vector<32x1xf32> to vector<32x32xf32>
    %74 = arith.subf %70, %73 : vector<32x32xf32>
    %75 = math.exp %74 : vector<32x32xf32>
    %cst_30 = arith.constant dense<0.000000e+00> : vector<32xf32>
    %76 = vector.multi_reduction <add>, %75, %cst_30 [1] : vector<32x32xf32> to vector<32xf32>
    %77 = vector.shape_cast %76 : vector<32xf32> to vector<32x1xf32>
    %78 = vector.broadcast %77 : vector<32x1xf32> to vector<32x32xf32>
    %79 = arith.divf %75, %78 : vector<32x32xf32>
    %cst_31 = arith.constant dense<0.000000e+00> : vector<32x8xf32>
    %80 = tpu.matmul %79, %66, %cst_31 {dimension_numbers = #tpu.dot_dimension_numbers<[1], [0], [0], [1], [0, 0, 1, 1], [], []>} : vector<32x32xf32>, vector<32x8xf32>, vector<32x8xf32> -> vector<32x8xf32>
    %81 = vector.extract_strided_slice %39 {offsets = [8, 0], sizes = [8, 32], strides = [1, 1]} : vector<32x32xf32> to vector<8x32xf32>
    %cst_32 = arith.constant dense<0.000000e+00> : vector<32x32xf32>
    %82 = tpu.matmul %80, %81, %cst_32 {dimension_numbers = #tpu.dot_dimension_numbers<[1], [0], [0], [1], [0, 0, 1, 1], [], []>} : vector<32x8xf32>, vector<8x32xf32>, vector<32x32xf32> -> vector<32x32xf32>
    %83 = arith.addf %63, %82 : vector<32x32xf32>
    %84 = vector.extract_strided_slice %38 {offsets = [0, 16], sizes = [32, 8], strides = [1, 1]} : vector<32x96xf32> to vector<32x8xf32>
    %85 = vector.extract_strided_slice %38 {offsets = [0, 48], sizes = [32, 8], strides = [1, 1]} : vector<32x96xf32> to vector<32x8xf32>
    %86 = vector.extract_strided_slice %38 {offsets = [0, 80], sizes = [32, 8], strides = [1, 1]} : vector<32x96xf32> to vector<32x8xf32>
    %cst_33 = arith.constant dense<0.000000e+00> : vector<32x32xf32>
    %87 = tpu.matmul %84, %85, %cst_33 {dimension_numbers = #tpu.dot_dimension_numbers<[1], [1], [0], [0], [0, 0, 1, 0], [], []>} : vector<32x8xf32>, vector<32x8xf32>, vector<32x32xf32> -> vector<32x32xf32>
    %cst_34 = arith.constant 0.353553385 : f32
    %88 = vector.broadcast %cst_34 : f32 to vector<32x32xf32>
    %89 = arith.mulf %87, %88 : vector<32x32xf32>
    %90 = arith.addf %89, %33 : vector<32x32xf32>
    %cst_35 = arith.constant dense<0xFF800000> : vector<32xf32>
    %91 = vector.multi_reduction <maximumf>, %90, %cst_35 [1] : vector<32x32xf32> to vector<32xf32>
    %92 = vector.shape_cast %91 : vector<32xf32> to vector<32x1xf32>
    %93 = vector.broadcast %92 : vector<32x1xf32> to vector<32x32xf32>
    %94 = arith.subf %90, %93 : vector<32x32xf32>
    %95 = math.exp %94 : vector<32x32xf32>
    %cst_36 = arith.constant dense<0.000000e+00> : vector<32xf32>
    %96 = vector.multi_reduction <add>, %95, %cst_36 [1] : vector<32x32xf32> to vector<32xf32>
    %97 = vector.shape_cast %96 : vector<32xf32> to vector<32x1xf32>
    %98 = vector.broadcast %97 : vector<32x1xf32> to vector<32x32xf32>
    %99 = arith.divf %95, %98 : vector<32x32xf32>
    %cst_37 = arith.constant dense<0.000000e+00> : vector<32x8xf32>
    %100 = tpu.matmul %99, %86, %cst_37 {dimension_numbers = #tpu.dot_dimension_numbers<[1], [0], [0], [1], [0, 0, 1, 1], [], []>} : vector<32x32xf32>, vector<32x8xf32>, vector<32x8xf32> -> vector<32x8xf32>
    %101 = vector.extract_strided_slice %39 {offsets = [16, 0], sizes = [8, 32], strides = [1, 1]} : vector<32x32xf32> to vector<8x32xf32>
    %cst_38 = arith.constant dense<0.000000e+00> : vector<32x32xf32>
    %102 = tpu.matmul %100, %101, %cst_38 {dimension_numbers = #tpu.dot_dimension_numbers<[1], [0], [0], [1], [0, 0, 1, 1], [], []>} : vector<32x8xf32>, vector<8x32xf32>, vector<32x32xf32> -> vector<32x32xf32>
    %103 = arith.addf %83, %102 : vector<32x32xf32>
    %104 = vector.extract_strided_slice %38 {offsets = [0, 24], sizes = [32, 8], strides = [1, 1]} : vector<32x96xf32> to vector<32x8xf32>
    %105 = vector.extract_strided_slice %38 {offsets = [0, 56], sizes = [32, 8], strides = [1, 1]} : vector<32x96xf32> to vector<32x8xf32>
    %106 = vector.extract_strided_slice %38 {offsets = [0, 88], sizes = [32, 8], strides = [1, 1]} : vector<32x96xf32> to vector<32x8xf32>
    %cst_39 = arith.constant dense<0.000000e+00> : vector<32x32xf32>
    %107 = tpu.matmul %104, %105, %cst_39 {dimension_numbers = #tpu.dot_dimension_numbers<[1], [1], [0], [0], [0, 0, 1, 0], [], []>} : vector<32x8xf32>, vector<32x8xf32>, vector<32x32xf32> -> vector<32x32xf32>
    %cst_40 = arith.constant 0.353553385 : f32
    %108 = vector.broadcast %cst_40 : f32 to vector<32x32xf32>
    %109 = arith.mulf %107, %108 : vector<32x32xf32>
    %110 = arith.addf %109, %33 : vector<32x32xf32>
    %cst_41 = arith.constant dense<0xFF800000> : vector<32xf32>
    %111 = vector.multi_reduction <maximumf>, %110, %cst_41 [1] : vector<32x32xf32> to vector<32xf32>
    %112 = vector.shape_cast %111 : vector<32xf32> to vector<32x1xf32>
    %113 = vector.broadcast %112 : vector<32x1xf32> to vector<32x32xf32>
    %114 = arith.subf %110, %113 : vector<32x32xf32>
    %115 = math.exp %114 : vector<32x32xf32>
    %cst_42 = arith.constant dense<0.000000e+00> : vector<32xf32>
    %116 = vector.multi_reduction <add>, %115, %cst_42 [1] : vector<32x32xf32> to vector<32xf32>
    %117 = vector.shape_cast %116 : vector<32xf32> to vector<32x1xf32>
    %118 = vector.broadcast %117 : vector<32x1xf32> to vector<32x32xf32>
    %119 = arith.divf %115, %118 : vector<32x32xf32>
    %cst_43 = arith.constant dense<0.000000e+00> : vector<32x8xf32>
    %120 = tpu.matmul %119, %106, %cst_43 {dimension_numbers = #tpu.dot_dimension_numbers<[1], [0], [0], [1], [0, 0, 1, 1], [], []>} : vector<32x32xf32>, vector<32x8xf32>, vector<32x8xf32> -> vector<32x8xf32>
    %121 = vector.extract_strided_slice %39 {offsets = [24, 0], sizes = [8, 32], strides = [1, 1]} : vector<32x32xf32> to vector<8x32xf32>
    %cst_44 = arith.constant dense<0.000000e+00> : vector<32x32xf32>
    %122 = tpu.matmul %120, %121, %cst_44 {dimension_numbers = #tpu.dot_dimension_numbers<[1], [0], [0], [1], [0, 0, 1, 1], [], []>} : vector<32x8xf32>, vector<8x32xf32>, vector<32x32xf32> -> vector<32x32xf32>
    %123 = arith.addf %103, %122 : vector<32x32xf32>
    %124 = vector.extract_strided_slice %1 {offsets = [4, 0], sizes = [1, 32], strides = [1, 1]} : vector<6x32xf32> to vector<1x32xf32>
    %125 = vector.extract_strided_slice %1 {offsets = [5, 0], sizes = [1, 32], strides = [1, 1]} : vector<6x32xf32> to vector<1x32xf32>
    %cst_45 = arith.constant dense<0.000000e+00> : vector<32xf32>
    %126 = vector.multi_reduction <add>, %123, %cst_45 [1] : vector<32x32xf32> to vector<32xf32>
    %127 = vector.shape_cast %126 : vector<32xf32> to vector<32x1xf32>
    %cst_46 = arith.constant 3.200000e+01 : f32
    %128 = vector.broadcast %cst_46 : f32 to vector<32x1xf32>
    %129 = arith.divf %127, %128 : vector<32x1xf32>
    %130 = vector.broadcast %129 : vector<32x1xf32> to vector<32x32xf32>
    %131 = arith.subf %123, %130 : vector<32x32xf32>
    %132 = arith.mulf %131, %131 : vector<32x32xf32>
    %cst_47 = arith.constant dense<0.000000e+00> : vector<32xf32>
    %133 = vector.multi_reduction <add>, %132, %cst_47 [1] : vector<32x32xf32> to vector<32xf32>
    %134 = vector.shape_cast %133 : vector<32xf32> to vector<32x1xf32>
    %cst_48 = arith.constant 3.200000e+01 : f32
    %135 = vector.broadcast %cst_48 : f32 to vector<32x1xf32>
    %136 = arith.divf %134, %135 : vector<32x1xf32>
    %137 = vector.broadcast %129 : vector<32x1xf32> to vector<32x32xf32>
    %138 = arith.subf %123, %137 : vector<32x32xf32>
    %cst_49 = arith.constant 9.99999974E-6 : f32
    %139 = vector.broadcast %cst_49 : f32 to vector<32x1xf32>
    %140 = arith.addf %136, %139 : vector<32x1xf32>
    %141 = math.rsqrt %140 : vector<32x1xf32>
    %142 = vector.broadcast %141 : vector<32x1xf32> to vector<32x32xf32>
    %143 = arith.mulf %138, %142 : vector<32x32xf32>
    %144 = vector.broadcast %124 : vector<1x32xf32> to vector<32x32xf32>
    %145 = arith.mulf %143, %144 : vector<32x32xf32>
    %146 = vector.broadcast %125 : vector<1x32xf32> to vector<32x32xf32>
    %147 = arith.addf %145, %146 : vector<32x32xf32>
    %c0_50 = arith.constant 0 : index
    %c0_51 = arith.constant 0 : index
    %148 = vector.load %arg10[%c0_50, %c0_51] : memref<64x32xf32, #tpu.memory_space<vmem>>, vector<64x32xf32>
    %cst_52 = arith.constant dense<0.000000e+00> : vector<64x32xf32>
    %149 = tpu.matmul %148, %147, %cst_52 {dimension_numbers = #tpu.dot_dimension_numbers<[1], [1], [0], [0], [0, 0, 1, 0], [], []>} : vector<64x32xf32>, vector<32x32xf32>, vector<64x32xf32> -> vector<64x32xf32>
    %c0_53 = arith.constant 0 : index
    %c0_54 = arith.constant 0 : index
    %150 = vector.load %arg11[%c0_53, %c0_54] : memref<32x21xf32, #tpu.memory_space<vmem>>, vector<32x21xf32>
    %c0_55 = arith.constant 0 : index
    %c0_56 = arith.constant 0 : index
    %151 = vector.load %arg3[%c0_55, %c0_56] : memref<21x256xf32, #tpu.memory_space<vmem>>, vector<21x256xf32>
    %cst_57 = arith.constant dense<0.000000e+00> : vector<32x256xf32>
    %152 = tpu.matmul %150, %151, %cst_57 {dimension_numbers = #tpu.dot_dimension_numbers<[1], [0], [0], [1], [0, 0, 1, 1], [], []>} : vector<32x21xf32>, vector<21x256xf32>, vector<32x256xf32> -> vector<32x256xf32>
    %153 = tpu.concatenate %152, %152 in 1 : vector<32x256xf32>, vector<32x256xf32> -> vector<32x512xf32>
    %c0_58 = arith.constant 0 : index
    %c0_59 = arith.constant 0 : index
    %154 = vector.load %arg4[%c0_58, %c0_59] : memref<64x512xf32, #tpu.memory_space<vmem>>, vector<64x512xf32>
    %155 = vector.extract_strided_slice %149 {offsets = [0, 0], sizes = [32, 32], strides = [1, 1]} : vector<64x32xf32> to vector<32x32xf32>
    %156 = vector.extract_strided_slice %154 {offsets = [0, 0], sizes = [32, 512], strides = [1, 1]} : vector<64x512xf32> to vector<32x512xf32>
    %cst_60 = arith.constant dense<0.000000e+00> : vector<32x512xf32>
    %157 = tpu.matmul %155, %156, %cst_60 {dimension_numbers = #tpu.dot_dimension_numbers<[1], [0], [0], [1], [0, 0, 1, 1], [], []>} : vector<32x32xf32>, vector<32x512xf32>, vector<32x512xf32> -> vector<32x512xf32>
    %158 = vector.extract_strided_slice %149 {offsets = [32, 0], sizes = [32, 32], strides = [1, 1]} : vector<64x32xf32> to vector<32x32xf32>
    %159 = vector.extract_strided_slice %154 {offsets = [32, 0], sizes = [32, 512], strides = [1, 1]} : vector<64x512xf32> to vector<32x512xf32>
    %cst_61 = arith.constant dense<0.000000e+00> : vector<32x512xf32>
    %160 = tpu.matmul %158, %159, %cst_61 {dimension_numbers = #tpu.dot_dimension_numbers<[1], [0], [0], [1], [0, 0, 1, 1], [], []>} : vector<32x32xf32>, vector<32x512xf32>, vector<32x512xf32> -> vector<32x512xf32>
    %161 = arith.addf %157, %160 : vector<32x512xf32>
    %162 = arith.addf %161, %153 : vector<32x512xf32>
    %cst_62 = arith.constant 0.000000e+00 : f32
    %163 = vector.broadcast %cst_62 : f32 to vector<32x512xf32>
    %164 = arith.maximumf %162, %163 : vector<32x512xf32>
    %c0_63 = arith.constant 0 : index
    %c0_64 = arith.constant 0 : index
    %165 = vector.load %arg12[%c0_63, %c0_64] : memref<5x32xf32, #tpu.memory_space<vmem>>, vector<5x32xf32>
    %cst_65 = arith.constant dense<0.000000e+00> : vector<5x512xf32>
    %166 = tpu.matmul %165, %164, %cst_65 {dimension_numbers = #tpu.dot_dimension_numbers<[1], [0], [0], [1], [0, 0, 1, 1], [], []>} : vector<5x32xf32>, vector<32x512xf32>, vector<5x512xf32> -> vector<5x512xf32>
    %c0_66 = arith.constant 0 : index
    %c0_67 = arith.constant 0 : index
    %167 = vector.load %arg13[%c0_66, %c0_67] : memref<5x1xf32, #tpu.memory_space<vmem>>, vector<5x1xf32>
    %168 = vector.broadcast %167 : vector<5x1xf32> to vector<5x512xf32>
    %169 = arith.addf %166, %168 : vector<5x512xf32>
    %c0_68 = arith.constant 0 : index
    %c0_69 = arith.constant 0 : index
    %170 = vector.load %arg2[%c0_68, %c0_69] : memref<1x512xf32, #tpu.memory_space<vmem>>, vector<1x512xf32>
    %171 = vector.broadcast %170 : vector<1x512xf32> to vector<5x512xf32>
    %172 = arith.mulf %169, %171 : vector<5x512xf32>
    %c0_70 = arith.constant 0 : index
    %c0_71 = arith.constant 0 : index
    %173 = vector.load %arg14[%c0_70, %c0_71] : memref<5x512xf32, #tpu.memory_space<vmem>>, vector<5x512xf32>
    tpu.vector_store %arg14[%c0_70, %c0_71], %172 {strides = array<i32>} : memref<5x512xf32, #tpu.memory_space<vmem>>, vector<5x512xf32>,
    return
  }
}

</mosaic_0001>

<bundles_post_ra>
// kernel: relation_classifier_forward.1
= control target key start
LH: loop header
LB: loop body
LE: loop exit
PB: predicated region body
PF: predicated region fallthrough
CT: control target
= control target key end

     0   :  { %vm60_vm0 = vcmask 261120   ;;  %v56_v8 = vlaneseq  ;;  %vm364_vm1 = vcmask 64512   ;;  %s3339_s22 = smov 96   ;;  %s3341_s23 = smov 120   ;;  %vm2105_vm2 = vcmask 1044480   ;;  %s4101_s5 = inlined_call_operand.vmem [shape: f32[32,32], index: 5, kind: input, shape index: {}]   ;;  %s4102_s0 = inlined_call_operand.vmem [shape: f32[32,32], index: 0, kind: input, shape index: {}]   ;;  %s4103_s6 = inlined_call_operand.vmem [shape: f32[6,32], index: 6, kind: input, shape index: {}]   ;;  %s4104_s7 = inlined_call_operand.vmem [shape: f32[32,96], index: 7, kind: input, shape index: {}]   ;;  %s4105_s8 = inlined_call_operand.vmem [shape: f32[1,96], index: 8, kind: input, shape index: {}]   ;;  %s4106_s1 = inlined_call_operand.vmem [shape: f32[32,32], index: 1, kind: input, shape index: {}]   ;;  %s4107_s9 = inlined_call_operand.vmem [shape: f32[32,32], index: 9, kind: input, shape index: {}]   ;;  %s4108_s10 = inlined_call_operand.vmem [shape: f32[64,32], index: 10, kind: input, shape index: {}]   ;;  %s4109_s3 = inlined_call_operand.vmem [shape: f32[21,256], index: 3, kind: input, shape index: {}]   ;;  %s4110_s11 = inlined_call_operand.vmem [shape: f32[32,21], index: 11, kind: input, shape index: {}]   ;;  %s4111_s4 = inlined_call_operand.vmem [shape: f32[64,512], index: 4, kind: input, shape index: {}]   ;;  %s4112_s13 = inlined_call_operand.vmem [shape: f32[5,1], index: 13, kind: input, shape index: {}]   ;;  %s4113_s12 = inlined_call_operand.vmem [shape: f32[5,32], index: 12, kind: input, shape index: {}]   ;;  %s4114_s2 = inlined_call_operand.vmem [shape: f32[1,512], index: 2, kind: input, shape index: {}]   ;;  %s4115_s14 = inlined_call_operand.vmem [shape: f32[5,512], index: 14, kind: output, shape index: {}]  }
   0x1   :  { %v55_v0 = vld [vmem:[%s4101_s5 + $0x18] sm:$0xff]  ;;  %v54_v1 = vld [vmem:[%s4101_s5 + $0x10] sm:$0xff]  ;;  %v47_v2 = vld [vmem:[%s4102_s0] sm:$0xff]  ;;  %s3343_s30 = smov 80   ;;  %s3344_s15 = smov 112   ;;  %vm2092_vm3 = vcmask 171008  }
   0x2   :  { %3052 = vmatprep.subr.mxu0 %v55_v0  ;;  %v53_v3 = vld [vmem:[%s4101_s5 + $0x8] sm:$0xff]  ;;  %3060 = vmatprep.mubr.msk.f32.mxu0 %vm60_vm0, %v47_v2  ;;  %v52_v4 = vld [vmem:[%s4101_s5] sm:$0xff]  ;;  %v49_v6 = vld [vmem:[%s4102_s0 + $0x10] sm:$0xff]  ;;  %v3455_v9 = vshrl.u32 %v56_v8, 7  ;;  %s3345_s18 = smov 56   ;;  %s3346_s19 = smov 72  }
   0x3   :  { %3053 = vmatpush3.msra.mxu0 %v55_v0  ;;  %v48_v5 = vld [vmem:[%s4102_s0 + $0x8] sm:$0xff]  ;;  %v50_v7 = vld [vmem:[%s4102_s0 + $0x18] sm:$0xff]  ;;  %v3461_v11 = vld [vmem:[%s4103_s6] sm:$0x3f]  ;;  %s3347_s20 = smov 104   ;;  %s3349_s26 = smov 40  }
   0x4   :  { %3054 = vmatprep.subr.mxu0 %v54_v1  ;;  %v58_v10 = vsub.s32 0, %v3455_v9  ;;  %v238_v49 = vld [vmem:[%s4104_s7 + $0x18] sm:$0xff]  ;;  %v237_v50 = vld [vmem:[%s4104_s7 + $0x10] sm:$0xff]  ;;  %v236_v51 = vld [vmem:[%s4104_s7 + $0x8] sm:$0xff]  ;;  %v225_v2 = vsub.s32 2, %v3455_v9 }
   0x5   :  { %3055 = vmatpush3.msra.mxu0 %v54_v1  ;;  %3066 = vmatprep.subr.mxu1 %v238_v49  ;;  %v235_v52 = vld [vmem:[%s4104_s7] sm:$0xff]  ;;  %v217_v1 = vsub.s32 1, %v3455_v9 }
   0x6   :  { %3056 = vmatprep.subr.mxu0 %v53_v3  ;;  %v59_v12 = vrot.slane %v3461_v11, %v58_v10  ;;  %3067 = vmatpush3.msra.mxu1 %v238_v49 }
   0x7   :  { %3057 = vmatpush3.msra.mxu0 %v53_v3  ;;  %3068 = vmatprep.subr.mxu1 %v237_v50  ;;  %v218_v3 = vrot.slane %v3461_v11, %v217_v1 }
   0x8   :  { %3058 = vmatprep.subr.mxu0 %v52_v4  ;;  %3069 = vmatpush3.msra.mxu1 %v237_v50 }
   0x9   :  { %3059 = vmatpush3.msra.mxu0 %v52_v4  ;;  %3070 = vmatprep.subr.mxu1 %v236_v51 }
   0xa   :  { %3061 = vmatmul.mubr.msk.f32.vlgmr.msra.gmra.mxu0 %vm60_vm0, %v48_v5  ;;  %3071 = vmatpush3.msra.mxu1 %v236_v51 }
   0xb   :  { %3063 = vmatprep.mubr.msk.f32.mxu0 %vm60_vm0, %v49_v6  ;;  %3072 = vmatprep.subr.mxu1 %v235_v52  ;;  %v226_v6 = vrot.slane %v3461_v11, %v225_v2 }
   0xc   :  { %3073 = vmatpush3.msra.mxu1 %v235_v52 }
   0xe   :  { %3064 = vmatmul.mubr.msk.f32.gmra.mxu0 %vm60_vm0, %v50_v7 }
  0xca   :  { %v3062_v13 = vpop.f32.mrf.mxu0 }
  0xcb   :  { %v145_v15 = vadd.f32 %v3062_v13, %v59_v12 }
  0xcc   :  { %v139_v14 = vpop.f32.mrf.mxu0 }
  0xcd   :  { %v140_v16 = vadd.f32 %v139_v14, %v59_v12  ;;  %v159_v20 = vmax.f32 %v145_v15, 0.0 }
  0xce   :  { %v3065_v17 = vpop.f32.mrf.mxu0 }
  0xcf   :  { %v158_v18 = vmax.f32 %v140_v16, 0.0  ;;  %v155_v21 = vadd.f32 %v3065_v17, %v59_v12  ;;  %v165_v27 = vsel %vm60_vm0, %v159_v20, 0.0 }
  0xd0   :  { %v149_v19 = vpop.f32.mrf.mxu0 }
  0xd1   :  { %v150_v22 = vadd.f32 %v149_v19, %v59_v12  ;;  %v162_v23 = vsel %vm60_vm0, %v158_v18, 0.0  ;;  %v161_v25 = vmax.f32 %v155_v21, 0.0 }
  0xd2   :  { %163 = vadd.xlane.f32.xlu0 %v162_v23 }
  0xd3   :  { %v160_v24 = vmax.f32 %v150_v22, 0.0  ;;  %v171_v28 = vsel %vm60_vm0, %v161_v25, 0.0 }
  0xd5   :  { %v168_v26 = vsel %vm60_vm0, %v160_v24, 0.0 }
  0xd6   :  { %169 = vadd.xlane.f32.xlu1 %v168_v26  ;;  %166 = vadd.xlane.f32.xlu0 %v165_v27 }
  0xda   :  { %172 = vadd.xlane.f32.xlu1 %v171_v28 }
 0x15b   :  { %v164_v29 = vpop.xlane.xlu0 %163 }
 0x15c   :  { %v175_v30 = vmul.f32 0.03125, %v164_v29 }
 0x15e   :  { %v179_v31 = vsub.f32 %v158_v18, %v175_v30 }
 0x15f   :  { %v170_v32 = vpop.xlane.xlu1 %169  ;;  %v167_v33 = vpop.xlane.xlu0 %166 }
 0x160   :  { %v177_v34 = vmul.f32 0.03125, %v170_v32  ;;  %v176_v35 = vmul.f32 0.03125, %v167_v33  ;;  %v183_v36 = vmul.f32 %v179_v31, %v179_v31 }
 0x162   :  { %v181_v37 = vsub.f32 %v160_v24, %v177_v34  ;;  %v180_v38 = vsub.f32 %v159_v20, %v176_v35  ;;  %v187_v39 = vsel %vm60_vm0, %v183_v36, 0.0  ;;  %v2835_v24 = vld [vmem:[%s4105_s8] ss:$0 sm:$0xff]  ;;  %s3340_s8 = smov 88  }
 0x163   :  { %v173_v40 = vpop.xlane.xlu1 %172  ;;  %188 = vadd.xlane.f32.xlu0 %v187_v39 }
 0x164   :  { %v178_v41 = vmul.f32 0.03125, %v173_v40  ;;  %v185_v42 = vmul.f32 %v181_v37, %v181_v37  ;;  %v184_v43 = vmul.f32 %v180_v38, %v180_v38 }
 0x166   :  { %v182_v44 = vsub.f32 %v161_v25, %v178_v41  ;;  %v193_v45 = vsel %vm60_vm0, %v185_v42, 0.0  ;;  %v190_v46 = vsel %vm60_vm0, %v184_v43, 0.0 }
 0x167   :  { %194 = vadd.xlane.f32.xlu0 %v193_v45  ;;  %191 = vadd.xlane.f32.xlu1 %v190_v46  ;;  %v3552_v45 = vld [vmem:[%s4106_s1 + $0x8] sm:$0xff] }
 0x168   :  { %v186_v47 = vmul.f32 %v182_v44, %v182_v44 }
 0x16a   :  { %v196_v48 = vsel %vm60_vm0, %v186_v47, 0.0 }
 0x16b   :  { %197 = vadd.xlane.f32.xlu1 %v196_v48  ;;  %v3557_v48 = vld [vmem:[%s4106_s1] sm:$0xff] }
 0x1ec   :  { %v189_v53 = vpop.xlane.xlu0 %188 }
 0x1ed   :  { %v199_v54 = vmul.f32 0.03125, %v189_v53 }
 0x1ef   :  { %v203_v55 = vadd.f32 1e-05, %v199_v54 }
 0x1f0   :  { %v192_v56 = vpop.xlane.xlu1 %191  ;;  %v195_v57 = vpop.xlane.xlu0 %194 }
 0x1f1   :  { %3258 = vrsqrt.f32 %v203_v55  ;;  %v200_v58 = vmul.f32 0.03125, %v192_v56  ;;  %v201_v59 = vmul.f32 0.03125, %v195_v57  ;;  %v3565_v55 = vld [vmem:[%s4106_s1 + $0x10] sm:$0xff] }
 0x1f3   :  { %v204_v60 = vadd.f32 1e-05, %v200_v58  ;;  %v205_v61 = vadd.f32 1e-05, %v201_v59  ;;  %v3571_v59 = vld [vmem:[%s4106_s1 + $0x18] sm:$0xff]  ;;  %s3342_s1 = smov 64  }
 0x1f4   :  { %v198_v62 = vpop.xlane.xlu1 %197 }
 0x1f5   :  { %3260 = vrsqrt.f32 %v204_v60  ;;  %v202_v63 = vmul.f32 0.03125, %v198_v62 }
 0x1f6   :  { %3262 = vrsqrt.f32 %v205_v61 }
 0x1f7   :  { %v206_v0 = vadd.f32 1e-05, %v202_v63 }
 0x1f9   :  { %3264 = vrsqrt.f32 %v206_v0 }
 0x1fe   :  { %v3259_v4 = vpop.eup %3258 }
 0x1ff   :  { %v211_v5 = vmul.f32 %v3259_v4, %v179_v31 }
 0x201   :  { %v219_v7 = vmul.f32 %v218_v3, %v211_v5 }
 0x202   :  { %v3261_v8 = vpop.eup %3260 }
 0x203   :  { %v3263_v12 = vpop.eup %3262  ;;  %v227_v13 = vadd.f32 %v226_v6, %v219_v7  ;;  %v212_v14 = vmul.f32 %v3261_v8, %v180_v38 }
 0x204   :  { %v213_v15 = vmul.f32 %v3263_v12, %v181_v37 }
 0x205   :  { %3074 = vmatprep.mubr.msk.f32.mxu1 %vm60_vm0, %v227_v13  ;;  %v220_v16 = vmul.f32 %v218_v3, %v212_v14 }
 0x206   :  { %v3265_v17 = vpop.eup %3264  ;;  %v221_v18 = vmul.f32 %v218_v3, %v213_v15 }
 0x207   :  { %v228_v19 = vadd.f32 %v226_v6, %v220_v16  ;;  %v214_v20 = vmul.f32 %v3265_v17, %v182_v44 }
 0x208   :  { %v229_v21 = vadd.f32 %v226_v6, %v221_v18 }
 0x209   :  { %3075 = vmatmul.mubr.msk.f32.vlgmr.msra.gmra.mxu1 %vm60_vm0, %v228_v19  ;;  %v222_v22 = vmul.f32 %v218_v3, %v214_v20 }
 0x20a   :  { %3077 = vmatprep.mubr.msk.f32.mxu1 %vm60_vm0, %v229_v21 }
 0x20b   :  { %v230_v11 = vadd.f32 %v226_v6, %v222_v22 }
 0x20d   :  { %3078 = vmatmul.mubr.msk.f32.gmra.mxu1 %vm60_vm0, %v230_v11 }
 0x2c9   :  { %v3076_v23 = vpop.f32.mrf.mxu1 }
 0x2ca   :  { %v3511_v31 = vadd.f32 %v3076_v23, %v2835_v24 }
 0x2cb   :  { %v324_v25 = vpop.f32.mrf.mxu1 }
 0x2cc   :  { %v3501_v26 = vadd.f32 %v2835_v24, %v324_v25 }
 0x2cd   :  { %v3079_v27 = vpop.f32.mrf.mxu1 }
 0x2ce   :  { %v3503_v28 = vadd.f32 %v3079_v27, %v2835_v24  ;;  %3088 = vmatprep.mubr.msk.f32.mxu0 %vm364_vm1, %v3501_v26 }
 0x2cf   :  { %v334_v29 = vpop.f32.mrf.mxu1 }
 0x2d0   :  { %v3507_v30 = vadd.f32 %v2835_v24, %v334_v29  ;;  %362 = vrot.lane.b32.xlu0 %v3503_v28, %s3339_s22 }
 0x2d2   :  { %360 = vrot.lane.b32.xlu1 %v3507_v30, %s3339_s22 }
 0x2d4   :  { %742 = vrot.lane.b32.xlu0 %v3503_v28, %s3340_s8 }
 0x2d6   :  { %358 = vrot.lane.b32.xlu1 %v3511_v31, %s3339_s22 }
 0x2d8   :  { %738 = vrot.lane.b32.xlu0 %v3511_v31, %s3340_s8 }
 0x2da   :  { %356 = vrot.lane.b32.xlu1 %v3501_v26, %s3339_s22  ;;  %s3348_s22 = smov 48  }
 0x2dc   :  { %728 = vrot.lane.b32.xlu0 %v3501_v26, %s3341_s23 }
 0x2de   :  { %740 = vrot.lane.b32.xlu1 %v3507_v30, %s3340_s8 }
 0x2e0   :  { %732 = vrot.lane.b32.xlu0 %v3507_v30, %s3341_s23 }
 0x2e2   :  { %736 = vrot.lane.b32.xlu1 %v3501_v26, %s3340_s8 }
 0x2e6   :  { %730 = vrot.lane.b32.xlu1 %v3511_v31, %s3341_s23 }
 0x2ea   :  { %734 = vrot.lane.b32.xlu1 %v3503_v28, %s3341_s23 }
 0x342   :  { %v363_v32 = vpop.permute.xlu0 %362 }
 0x343   :  { %3080 = vmatprep.subr.msk.mxu0 %vm364_vm1, %v363_v32 }
 0x344   :  { %3081 = vmatpush3.xpose.msk.msra.mxu0 %vm364_vm1, %v363_v32  ;;  %v361_v33 = vpop.permute.xlu1 %360 }
 0x345   :  { %3082 = vmatprep.subr.msk.mxu0 %vm364_vm1, %v361_v33 }
 0x346   :  { %v743_v35 = vpop.permute.xlu0 %742 }
 0x348   :  { %3083 = vmatpush3.xpose.msk.msra.mxu0 %vm364_vm1, %v361_v33  ;;  %v359_v34 = vpop.permute.xlu1 %358 }
 0x349   :  { %3084 = vmatprep.subr.msk.mxu0 %vm364_vm1, %v359_v34 }
 0x34a   :  { %v739_v37 = vpop.permute.xlu0 %738 }
 0x34c   :  { %3085 = vmatpush3.xpose.msk.msra.mxu0 %vm364_vm1, %v359_v34  ;;  %v357_v36 = vpop.permute.xlu1 %356 }
 0x34d   :  { %3086 = vmatprep.subr.msk.mxu0 %vm364_vm1, %v357_v36 }
 0x34e   :  { %v729_v39 = vpop.permute.xlu0 %728 }
 0x350   :  { %3087 = vmatpush3.xpose.msk.msra.mxu0 %vm364_vm1, %v357_v36  ;;  %v741_v38 = vpop.permute.xlu1 %740 }
 0x351   :  { %3116 = vmatprep.subr.msk.mxu0 %vm364_vm1, %v743_v35 }
 0x352   :  { %v733_v42 = vpop.permute.xlu0 %732 }
 0x353   :  { %3089 = vmatmul.mubr.msk.f32.vlgmr.msra.gmra.mxu0 %vm364_vm1, %v3511_v31 }
 0x354   :  { %3091 = vmatprep.mubr.msk.f32.mxu0 %vm364_vm1, %v3507_v30  ;;  %3117 = vmatpush3.xpose.msk.msra.mxu0 %vm364_vm1, %v743_v35  ;;  %v737_v40 = vpop.permute.xlu1 %736 }
 0x355   :  { %3118 = vmatprep.subr.msk.mxu0 %vm364_vm1, %v741_v38 }
 0x357   :  { %3092 = vmatmul.mubr.msk.f32.gmra.mxu0 %vm364_vm1, %v3503_v28 }
 0x358   :  { %3119 = vmatpush3.xpose.msk.msra.mxu0 %vm364_vm1, %v741_v38  ;;  %3124 = vmatprep.mubr.msk.f32.mxu0 %vm364_vm1, %v729_v39  ;;  %v731_v41 = vpop.permute.xlu1 %730 }
 0x359   :  { %3120 = vmatprep.subr.msk.mxu0 %vm364_vm1, %v739_v37 }
 0x35c   :  { %3121 = vmatpush3.xpose.msk.msra.mxu0 %vm364_vm1, %v739_v37  ;;  %v735_v43 = vpop.permute.xlu1 %734 }
 0x35d   :  { %3122 = vmatprep.subr.msk.mxu0 %vm364_vm1, %v737_v40 }
 0x360   :  { %3123 = vmatpush3.xpose.msk.msra.mxu0 %vm364_vm1, %v737_v40 }
 0x363   :  { %3125 = vmatmul.mubr.msk.f32.vlgmr.msra.gmra.mxu0 %vm364_vm1, %v731_v41 }
 0x364   :  { %3127 = vmatprep.mubr.msk.f32.mxu0 %vm364_vm1, %v733_v42 }
 0x367   :  { %3128 = vmatmul.mubr.msk.f32.gmra.mxu0 %vm364_vm1, %v735_v43 }
 0x413   :  { %v3090_v44 = vpop.f32.mrf.mxu0 }
 0x414   :  { %v467_v46 = vmul.f32 0.35355338, %v3090_v44 }
 0x415   :  { %v447_v47 = vpop.f32.mrf.mxu0 }
 0x416   :  { %v466_v49 = vmul.f32 0.35355338, %v447_v47  ;;  %v471_v50 = vadd.f32 %v467_v46, %v3552_v45 }
 0x417   :  { %v3093_v51 = vpop.f32.mrf.mxu0 }
 0x418   :  { %v477_v52 = vsel %vm60_vm0, %v471_v50, -inf  ;;  %v470_v53 = vadd.f32 %v466_v49, %v3557_v48  ;;  %v469_v56 = vmul.f32 0.35355338, %v3093_v51 }
 0x419   :  { %478 = vmax.xlane.f32.xlu1 %v477_v52  ;;  %v457_v54 = vpop.f32.mrf.mxu0 }
 0x41a   :  { %v468_v57 = vmul.f32 0.35355338, %v457_v54  ;;  %v474_v58 = vsel %vm60_vm0, %v470_v53, -inf  ;;  %v473_v62 = vadd.f32 %v469_v56, %v3571_v59 }
 0x41b   :  { %475 = vmax.xlane.f32.xlu0 %v474_v58 }
 0x41c   :  { %v472_v60 = vadd.f32 %v468_v57, %v3565_v55  ;;  %v483_v63 = vsel %vm60_vm0, %v473_v62, -inf }
 0x41e   :  { %v480_v61 = vsel %vm60_vm0, %v472_v60, -inf }
 0x41f   :  { %481 = vmax.xlane.f32.xlu0 %v480_v61 }
 0x423   :  { %484 = vmax.xlane.f32.xlu0 %v483_v63  ;;  %v3126_v24 = vpop.f32.mrf.mxu0 }
 0x424   :  { %v846_v38 = vmul.f32 0.35355338, %v3126_v24  ;;  %v343_v24 = vld [vmem:[%s4107_s9] sm:$0xff] }
 0x425   :  { %v826_v25 = vpop.f32.mrf.mxu0 }
 0x426   :  { %v845_v29 = vmul.f32 0.35355338, %v826_v25  ;;  %v3621_v42 = vadd.f32 %v846_v38, %v3552_v45 }
 0x427   :  { %v3129_v27 = vpop.f32.mrf.mxu0 }
 0x428   :  { %v3606_v34 = vadd.f32 %v845_v29, %v3557_v48  ;;  %v848_v35 = vmul.f32 0.35355338, %v3129_v27  ;;  %v856_v43 = vsel %vm60_vm0, %v3621_v42, -inf }
 0x429   :  { %v836_v32 = vpop.f32.mrf.mxu0 }
 0x42a   :  { %v847_v33 = vmul.f32 0.35355338, %v836_v32  ;;  %v853_v36 = vsel %vm60_vm0, %v3606_v34, -inf  ;;  %v3616_v40 = vadd.f32 %v848_v35, %v3571_v59 }
 0x42c   :  { %v3611_v37 = vadd.f32 %v847_v33, %v3565_v55  ;;  %v862_v41 = vsel %vm60_vm0, %v3616_v40, -inf }
 0x42e   :  { %v859_v39 = vsel %vm60_vm0, %v3611_v37, -inf }
 0x4a2   :  { %v479_v0 = vpop.xlane.xlu1 %478 }
 0x4a3   :  { %v487_v3 = vsub.f32 %v471_v50, %v479_v0 }
 0x4a4   :  { %v476_v4 = vpop.xlane.xlu0 %475 }
 0x4a5   :  { %v492_v5 = vmul.f32 1.442695, %v487_v3  ;;  %v486_v6 = vsub.f32 %v470_v53, %v476_v4 }
 0x4a7   :  { %3266 = vpow2.f32 %v492_v5  ;;  %v490_v7 = vmul.f32 1.442695, %v486_v6 }
 0x4a8   :  { %v482_v8 = vpop.xlane.xlu0 %481 }
 0x4a9   :  { %3268 = vpow2.f32 %v490_v7  ;;  %v488_v12 = vsub.f32 %v472_v60, %v482_v8 }
 0x4ab   :  { %v494_v13 = vmul.f32 1.442695, %v488_v12 }
 0x4ac   :  { %v485_v14 = vpop.xlane.xlu0 %484 }
 0x4ad   :  { %3270 = vpow2.f32 %v494_v13  ;;  %v489_v15 = vsub.f32 %v473_v62, %v485_v14 }
 0x4af   :  { %v496_v16 = vmul.f32 1.442695, %v489_v15 }
 0x4b1   :  { %3272 = vpow2.f32 %v496_v16 }
 0x4b4   :  { %v3577_v17 = vpop.eup %3266 }
 0x4b5   :  { %v501_v18 = vsel %vm60_vm0, %v3577_v17, 0.0 }
 0x4b6   :  { %v3581_v19 = vpop.eup %3268  ;;  %502 = vadd.xlane.f32.xlu1 %v501_v18 }
 0x4b7   :  { %v498_v20 = vsel %vm60_vm0, %v3581_v19, 0.0 }
 0x4b8   :  { %499 = vadd.xlane.f32.xlu0 %v498_v20 }
 0x4ba   :  { %v3585_v21 = vpop.eup %3270 }
 0x4bb   :  { %v504_v22 = vsel %vm60_vm0, %v3585_v21, 0.0 }
 0x4bc   :  { %505 = vadd.xlane.f32.xlu0 %v504_v22 }
 0x4be   :  { %v3589_v11 = vpop.eup %3272 }
 0x4bf   :  { %v507_v23 = vsel %vm60_vm0, %v3589_v11, 0.0 }
 0x4c0   :  { %508 = vadd.xlane.f32.xlu1 %v507_v23 }
 0x4d1   :  { %522 = vrot.lane.b32.xlu1 %v3507_v30, %s3342_s1 }
 0x4d2   :  { %524 = vrot.lane.b32.xlu0 %v3503_v28, %s3342_s1 }
 0x4d5   :  { %520 = vrot.lane.b32.xlu1 %v3511_v31, %s3342_s1 }
 0x4d6   :  { %1121 = vrot.lane.b32.xlu0 %v3503_v28, %s3343_s30 }
 0x4d9   :  { %518 = vrot.lane.b32.xlu1 %v3501_v26, %s3342_s1 }
 0x4da   :  { %1117 = vrot.lane.b32.xlu0 %v3511_v31, %s3343_s30 }
 0x4dd   :  { %1119 = vrot.lane.b32.xlu1 %v3507_v30, %s3343_s30 }
 0x4de   :  { %1107 = vrot.lane.b32.xlu0 %v3501_v26, %s3344_s15 }
 0x4e1   :  { %1115 = vrot.lane.b32.xlu1 %v3501_v26, %s3343_s30 }
 0x4e2   :  { %1111 = vrot.lane.b32.xlu0 %v3507_v30, %s3344_s15 }
 0x4e5   :  { %1109 = vrot.lane.b32.xlu1 %v3511_v31, %s3344_s15 }
 0x4e9   :  { %1113 = vrot.lane.b32.xlu1 %v3503_v28, %s3344_s15 }
 0x501   :  { %854 = vmax.xlane.f32.xlu0 %v853_v36 }
 0x505   :  { %860 = vmax.xlane.f32.xlu0 %v859_v39 }
 0x509   :  { %863 = vmax.xlane.f32.xlu0 %v862_v41 }
 0x50d   :  { %857 = vmax.xlane.f32.xlu1 %v856_v43 }
 0x53f   :  { %v503_v46 = vpop.xlane.xlu1 %502 }
 0x541   :  { %v500_v44 = vpop.xlane.xlu0 %499 }
 0x542   :  { %3274 = vrcp.f32 %v500_v44 }
 0x543   :  { %3276 = vrcp.f32 %v503_v46 }
 0x545   :  { %v506_v47 = vpop.xlane.xlu0 %505 }
 0x546   :  { %3278 = vrcp.f32 %v506_v47 }
 0x549   :  { %v525_v49 = vpop.permute.xlu0 %524  ;;  %v509_v50 = vpop.xlane.xlu1 %508 }
 0x54a   :  { %3280 = vrcp.f32 %v509_v50  ;;  %3094 = vmatprep.subr.mxu1 %v525_v49 }
 0x54b   :  { %3095 = vmatpush3.msra.mxu1 %v525_v49 }
 0x54d   :  { %v1122_v51 = vpop.permute.xlu0 %1121  ;;  %v523_v52 = vpop.permute.xlu1 %522 }
 0x54e   :  { %3096 = vmatprep.subr.mxu1 %v523_v52  ;;  %3152 = vmatprep.subr.msk.mxu0 %vm364_vm1, %v1122_v51 }
 0x54f   :  { %v3275_v53 = vpop.eup %3274  ;;  %3097 = vmatpush3.msra.mxu1 %v523_v52  ;;  %3153 = vmatpush3.xpose.msk.msra.mxu0 %vm364_vm1, %v1122_v51 }
 0x550   :  { %v511_v54 = vmul.f32 %v3275_v53, %v3581_v19  ;;  %v3277_v58 = vpop.eup %3276 }
 0x551   :  { %v1118_v56 = vpop.permute.xlu0 %1117  ;;  %v521_v57 = vpop.permute.xlu1 %520  ;;  %v513_v63 = vmul.f32 %v3277_v58, %v3577_v17 }
 0x552   :  { %3098 = vmatprep.subr.mxu1 %v521_v57  ;;  %3102 = vmatprep.mubr.msk.f32.mxu1 %vm60_vm0, %v511_v54 }
 0x553   :  { %3099 = vmatpush3.msra.mxu1 %v521_v57  ;;  %v3279_v60 = vpop.eup %3278 }
 0x554   :  { %v515_v3 = vmul.f32 %v3279_v60, %v3585_v21 }
 0x555   :  { %v1108_v61 = vpop.permute.xlu0 %1107  ;;  %v519_v62 = vpop.permute.xlu1 %518 }
 0x556   :  { %3100 = vmatprep.subr.mxu1 %v519_v62  ;;  %3160 = vmatprep.mubr.msk.f32.mxu0 %vm364_vm1, %v1108_v61 }
 0x557   :  { %v3281_v0 = vpop.eup %3280  ;;  %3101 = vmatpush3.msra.mxu1 %v519_v62 }
 0x558   :  { %3103 = vmatmul.mubr.msk.f32.vlgmr.msra.gmra.mxu1 %vm60_vm0, %v513_v63  ;;  %v517_v5 = vmul.f32 %v3281_v0, %v3589_v11  ;;  %3108 = vmatprep.subr.mxu1 %v343_v24 }
 0x559   :  { %3105 = vmatprep.mubr.msk.f32.mxu1 %vm60_vm0, %v515_v3  ;;  %v1120_v4 = vpop.permute.xlu1 %1119  ;;  %v1112_v8 = vpop.permute.xlu0 %1111  ;;  %3109 = vmatpush3.msra.mxu1 %v343_v24 }
 0x55a   :  { %3154 = vmatprep.subr.msk.mxu0 %vm364_vm1, %v1120_v4 }
 0x55b   :  { %3155 = vmatpush3.xpose.msk.msra.mxu0 %vm364_vm1, %v1120_v4 }
 0x55c   :  { %3106 = vmatmul.mubr.msk.f32.gmra.mxu1 %vm60_vm0, %v517_v5  ;;  %3156 = vmatprep.subr.msk.mxu0 %vm364_vm1, %v1118_v56 }
 0x55d   :  { %v1116_v6 = vpop.permute.xlu1 %1115 }
 0x55f   :  { %3157 = vmatpush3.xpose.msk.msra.mxu0 %vm364_vm1, %v1118_v56 }
 0x560   :  { %3158 = vmatprep.subr.msk.mxu0 %vm364_vm1, %v1116_v6 }
 0x561   :  { %v1110_v7 = vpop.permute.xlu1 %1109 }
 0x563   :  { %3159 = vmatpush3.xpose.msk.msra.mxu0 %vm364_vm1, %v1116_v6 }
 0x565   :  { %v1114_v12 = vpop.permute.xlu1 %1113 }
 0x566   :  { %3161 = vmatmul.mubr.msk.f32.vlgmr.msra.gmra.mxu0 %vm364_vm1, %v1110_v7 }
 0x567   :  { %3163 = vmatprep.mubr.msk.f32.mxu0 %vm364_vm1, %v1112_v8 }
 0x56a   :  { %3164 = vmatmul.mubr.msk.f32.gmra.mxu0 %vm364_vm1, %v1114_v12 }
 0x58a   :  { %v855_v13 = vpop.xlane.xlu0 %854 }
 0x58b   :  { %v865_v14 = vsub.f32 %v3606_v34, %v855_v13 }
 0x58d   :  { %v869_v15 = vmul.f32 1.442695, %v865_v14 }
 0x58e   :  { %v861_v16 = vpop.xlane.xlu0 %860 }
 0x58f   :  { %3282 = vpow2.f32 %v869_v15  ;;  %v867_v17 = vsub.f32 %v3611_v37, %v861_v16 }
 0x591   :  { %v873_v18 = vmul.f32 1.442695, %v867_v17 }
 0x592   :  { %v864_v19 = vpop.xlane.xlu0 %863 }
 0x593   :  { %3284 = vpow2.f32 %v873_v18  ;;  %v868_v20 = vsub.f32 %v3616_v40, %v864_v19 }
 0x595   :  { %v875_v11 = vmul.f32 1.442695, %v868_v20 }
 0x596   :  { %v858_v21 = vpop.xlane.xlu1 %857 }
 0x597   :  { %v866_v22 = vsub.f32 %v3621_v42, %v858_v21 }
 0x599   :  { %v871_v23 = vmul.f32 1.442695, %v866_v22 }
 0x59b   :  { %3286 = vpow2.f32 %v871_v23 }
 0x59c   :  { %v3652_v25 = vpop.eup %3282  ;;  %3288 = vpow2.f32 %v875_v11 }
 0x59d   :  { %v877_v27 = vsel %vm60_vm0, %v3652_v25, 0.0 }
 0x59e   :  { %878 = vadd.xlane.f32.xlu0 %v877_v27 }
 0x5a0   :  { %v3656_v29 = vpop.eup %3284 }
 0x5a1   :  { %v883_v32 = vsel %vm60_vm0, %v3656_v29, 0.0 }
 0x5a2   :  { %884 = vadd.xlane.f32.xlu0 %v883_v32 }
 0x5a8   :  { %v3660_v33 = vpop.eup %3286 }
 0x5a9   :  { %v880_v34 = vsel %vm60_vm0, %v3660_v33, 0.0  ;;  %v3664_v35 = vpop.eup %3288 }
 0x5aa   :  { %881 = vadd.xlane.f32.xlu1 %v880_v34  ;;  %v886_v36 = vsel %vm60_vm0, %v3664_v35, 0.0 }
 0x5ae   :  { %887 = vadd.xlane.f32.xlu1 %v886_v36 }
 0x5b8   :  { %903 = vrot.lane.b32.xlu0 %v3503_v28, %s3345_s18 }
 0x5bc   :  { %1500 = vrot.lane.b32.xlu0 %v3503_v28, %s3346_s19 }
 0x5bf   :  { %901 = vrot.lane.b32.xlu1 %v3507_v30, %s3345_s18 }
 0x5c0   :  { %1496 = vrot.lane.b32.xlu0 %v3511_v31, %s3346_s19 }
 0x5c3   :  { %899 = vrot.lane.b32.xlu1 %v3511_v31, %s3345_s18 }
 0x5c4   :  { %1486 = vrot.lane.b32.xlu0 %v3501_v26, %s3347_s20 }
 0x5c7   :  { %897 = vrot.lane.b32.xlu1 %v3501_v26, %s3345_s18 }
 0x5c8   :  { %1490 = vrot.lane.b32.xlu0 %v3507_v30, %s3347_s20 }
 0x5cb   :  { %1498 = vrot.lane.b32.xlu1 %v3507_v30, %s3346_s19 }
 0x5cf   :  { %1494 = vrot.lane.b32.xlu1 %v3501_v26, %s3346_s19 }
 0x5d3   :  { %1488 = vrot.lane.b32.xlu1 %v3511_v31, %s3347_s20 }
 0x5d7   :  { %1492 = vrot.lane.b32.xlu1 %v3503_v28, %s3347_s20 }
 0x618   :  { %v3104_v37 = vpop.f32.mrf.mxu1 }
 0x61a   :  { %v608_v38 = vpop.f32.mrf.mxu1 }
 0x61b   :  { %3110 = vmatprep.mubr.msk.f32.mxu1 %vm364_vm1, %v608_v38 }
 0x61c   :  { %v3107_v39 = vpop.f32.mrf.mxu1  ;;  %3111 = vmatmul.mubr.msk.f32.vlgmr.msra.gmra.mxu1 %vm364_vm1, %v3104_v37 }
 0x61e   :  { %v618_v40 = vpop.f32.mrf.mxu1 }
 0x61f   :  { %3113 = vmatprep.mubr.msk.f32.mxu1 %vm364_vm1, %v618_v40 }
 0x620   :  { %3114 = vmatmul.mubr.msk.f32.gmra.mxu1 %vm364_vm1, %v3107_v39 }
 0x626   :  { %v3162_v41 = vpop.f32.mrf.mxu0 }
 0x627   :  { %v1225_v42 = vmul.f32 0.35355338, %v3162_v41  ;;  %v879_v43 = vpop.xlane.xlu0 %878 }
 0x628   :  { %3290 = vrcp.f32 %v879_v43  ;;  %v1205_v44 = vpop.f32.mrf.mxu0 }
 0x629   :  { %v1224_v46 = vmul.f32 0.35355338, %v1205_v44  ;;  %v3685_v47 = vadd.f32 %v1225_v42, %v3552_v45 }
 0x62a   :  { %v3165_v49 = vpop.f32.mrf.mxu0 }
 0x62b   :  { %v885_v50 = vpop.xlane.xlu0 %884  ;;  %v1235_v51 = vsel %vm60_vm0, %v3685_v47, -inf  ;;  %v3690_v52 = vadd.f32 %v1224_v46, %v3557_v48  ;;  %v1227_v54 = vmul.f32 0.35355338, %v3165_v49 }
 0x62c   :  { %v1215_v53 = vpop.f32.mrf.mxu0  ;;  %1236 = vmax.xlane.f32.xlu1 %v1235_v51 }
 0x62d   :  { %v1226_v56 = vmul.f32 0.35355338, %v1215_v53  ;;  %v1232_v57 = vsel %vm60_vm0, %v3690_v52, -inf  ;;  %v3700_v62 = vadd.f32 %v1227_v54, %v3571_v59 }
 0x62e   :  { %1233 = vmax.xlane.f32.xlu0 %v1232_v57 }
 0x62f   :  { %v904_v58 = vpop.permute.xlu0 %903  ;;  %v3695_v60 = vadd.f32 %v1226_v56, %v3565_v55  ;;  %v1241_v4 = vsel %vm60_vm0, %v3700_v62, -inf }
 0x630   :  { %3130 = vmatprep.subr.mxu1 %v904_v58 }
 0x631   :  { %3131 = vmatpush3.msra.mxu1 %v904_v58  ;;  %v1238_v61 = vsel %vm60_vm0, %v3695_v60, -inf }
 0x632   :  { %1239 = vmax.xlane.f32.xlu0 %v1238_v61 }
 0x633   :  { %v1501_v63 = vpop.permute.xlu0 %1500  ;;  %v882_v0 = vpop.xlane.xlu1 %881 }
 0x634   :  { %3292 = vrcp.f32 %v882_v0  ;;  %3188 = vmatprep.subr.msk.mxu0 %vm364_vm1, %v1501_v63 }
 0x635   :  { %v3291_v3 = vpop.eup %3290  ;;  %3294 = vrcp.f32 %v885_v50  ;;  %3189 = vmatpush3.xpose.msk.msra.mxu0 %vm364_vm1, %v1501_v63 }
 0x636   :  { %1242 = vmax.xlane.f32.xlu0 %v1241_v4  ;;  %v890_v5 = vmul.f32 %v3291_v3, %v3652_v25  ;;  %v344_v25 = vld [vmem:[%s4107_s9 + $0x8] sm:$0xff] }
 0x637   :  { %v1497_v6 = vpop.permute.xlu0 %1496  ;;  %v888_v7 = vpop.xlane.xlu1 %887 }
 0x638   :  { %3296 = vrcp.f32 %v888_v7  ;;  %3138 = vmatprep.mubr.msk.f32.mxu1 %vm60_vm0, %v890_v5 }
 0x63b   :  { %v1487_v8 = vpop.permute.xlu0 %1486  ;;  %v902_v12 = vpop.permute.xlu1 %901 }
 0x63c   :  { %3132 = vmatprep.subr.mxu1 %v902_v12  ;;  %3196 = vmatprep.mubr.msk.f32.mxu0 %vm364_vm1, %v1487_v8 }
 0x63d   :  { %3133 = vmatpush3.msra.mxu1 %v902_v12 }
 0x63f   :  { %v900_v13 = vpop.permute.xlu1 %899  ;;  %v1491_v23 = vpop.permute.xlu0 %1490 }
 0x640   :  { %3134 = vmatprep.subr.mxu1 %v900_v13 }
 0x641   :  { %v3293_v14 = vpop.eup %3292  ;;  %3135 = vmatpush3.msra.mxu1 %v900_v13 }
 0x642   :  { %v3295_v15 = vpop.eup %3294  ;;  %v892_v17 = vmul.f32 %v3293_v14, %v3660_v33 }
 0x643   :  { %v898_v16 = vpop.permute.xlu1 %897  ;;  %v894_v19 = vmul.f32 %v3295_v15, %v3656_v29 }
 0x644   :  { %3136 = vmatprep.subr.mxu1 %v898_v16 }
 0x645   :  { %v3297_v18 = vpop.eup %3296  ;;  %3137 = vmatpush3.msra.mxu1 %v898_v16 }
 0x646   :  { %3139 = vmatmul.mubr.msk.f32.vlgmr.msra.gmra.mxu1 %vm60_vm0, %v892_v17  ;;  %v896_v21 = vmul.f32 %v3297_v18, %v3664_v35  ;;  %3144 = vmatprep.subr.mxu1 %v344_v25 }
 0x647   :  { %3141 = vmatprep.mubr.msk.f32.mxu1 %vm60_vm0, %v894_v19  ;;  %v1499_v20 = vpop.permute.xlu1 %1498  ;;  %3145 = vmatpush3.msra.mxu1 %v344_v25 }
 0x648   :  { %3190 = vmatprep.subr.msk.mxu0 %vm364_vm1, %v1499_v20 }
 0x649   :  { %3191 = vmatpush3.xpose.msk.msra.mxu0 %vm364_vm1, %v1499_v20 }
 0x64a   :  { %3142 = vmatmul.mubr.msk.f32.gmra.mxu1 %vm60_vm0, %v896_v21  ;;  %3192 = vmatprep.subr.msk.mxu0 %vm364_vm1, %v1497_v6 }
 0x64b   :  { %v1495_v22 = vpop.permute.xlu1 %1494 }
 0x64d   :  { %3193 = vmatpush3.xpose.msk.msra.mxu0 %vm364_vm1, %v1497_v6 }
 0x64e   :  { %3194 = vmatprep.subr.msk.mxu0 %vm364_vm1, %v1495_v22 }
 0x64f   :  { %v1489_v11 = vpop.permute.xlu1 %1488 }
 0x651   :  { %3195 = vmatpush3.xpose.msk.msra.mxu0 %vm364_vm1, %v1495_v22 }
 0x653   :  { %v1493_v24 = vpop.permute.xlu1 %1492 }
 0x654   :  { %3197 = vmatmul.mubr.msk.f32.vlgmr.msra.gmra.mxu0 %vm364_vm1, %v1489_v11 }
 0x655   :  { %3199 = vmatprep.mubr.msk.f32.mxu0 %vm364_vm1, %v1491_v23 }
 0x658   :  { %3200 = vmatmul.mubr.msk.f32.gmra.mxu0 %vm364_vm1, %v1493_v24 }
 0x6b5   :  { %v1237_v27 = vpop.xlane.xlu1 %1236 }
 0x6b6   :  { %v1245_v29 = vsub.f32 %v3685_v47, %v1237_v27 }
 0x6b7   :  { %v1234_v32 = vpop.xlane.xlu0 %1233 }
 0x6b8   :  { %v1250_v33 = vmul.f32 1.442695, %v1245_v29  ;;  %v1244_v34 = vsub.f32 %v3690_v52, %v1234_v32 }
 0x6ba   :  { %3298 = vpow2.f32 %v1250_v33  ;;  %v1248_v35 = vmul.f32 1.442695, %v1244_v34 }
 0x6bb   :  { %v1240_v36 = vpop.xlane.xlu0 %1239 }
 0x6bc   :  { %3300 = vpow2.f32 %v1248_v35  ;;  %v1246_v37 = vsub.f32 %v3695_v60, %v1240_v36 }
 0x6be   :  { %v1252_v38 = vmul.f32 1.442695, %v1246_v37 }
 0x6bf   :  { %v1243_v39 = vpop.xlane.xlu0 %1242 }
 0x6c0   :  { %3302 = vpow2.f32 %v1252_v38  ;;  %v1247_v40 = vsub.f32 %v3700_v62, %v1243_v39 }
 0x6c2   :  { %v1254_v41 = vmul.f32 1.442695, %v1247_v40 }
 0x6c4   :  { %3304 = vpow2.f32 %v1254_v41 }
 0x6c7   :  { %v3731_v42 = vpop.eup %3298 }
 0x6c8   :  { %v1259_v43 = vsel %vm60_vm0, %v3731_v42, 0.0 }
 0x6c9   :  { %v3301_v44 = vpop.eup %3300  ;;  %1260 = vadd.xlane.f32.xlu1 %v1259_v43 }
 0x6ca   :  { %v1256_v46 = vsel %vm60_vm0, %v3301_v44, 0.0 }
 0x6cb   :  { %1257 = vadd.xlane.f32.xlu0 %v1256_v46 }
 0x6cd   :  { %v3736_v47 = vpop.eup %3302 }
 0x6ce   :  { %v1262_v49 = vsel %vm60_vm0, %v3736_v47, 0.0 }
 0x6cf   :  { %1263 = vadd.xlane.f32.xlu0 %v1262_v49 }
 0x6d1   :  { %v3740_v50 = vpop.eup %3304 }
 0x6d2   :  { %v1265_v51 = vsel %vm60_vm0, %v3740_v50, 0.0 }
 0x6d3   :  { %1266 = vadd.xlane.f32.xlu1 %v1265_v51 }
 0x6dc   :  { %v3748_v52 = vpop.f32.mrf.mxu1 }
 0x6de   :  { %v3750_v53 = vpop.f32.mrf.mxu1 }
 0x6e0   :  { %v3752_v54 = vpop.f32.mrf.mxu1 }
 0x6e2   :  { %v3754_v56 = vpop.f32.mrf.mxu1 }
 0x6e4   :  { %1280 = vrot.lane.b32.xlu1 %v3507_v30, %s3348_s22 }
 0x6e5   :  { %1282 = vrot.lane.b32.xlu0 %v3503_v28, %s3348_s22 }
 0x6e8   :  { %1278 = vrot.lane.b32.xlu1 %v3511_v31, %s3348_s22 }
 0x6ec   :  { %1276 = vrot.lane.b32.xlu1 %v3501_v26, %s3348_s22 }
 0x706   :  { %v3140_v57 = vpop.f32.mrf.mxu1 }
 0x708   :  { %v987_v58 = vpop.f32.mrf.mxu1 }
 0x709   :  { %3146 = vmatprep.mubr.msk.f32.mxu1 %vm364_vm1, %v987_v58 }
 0x70a   :  { %v3143_v60 = vpop.f32.mrf.mxu1  ;;  %3147 = vmatmul.mubr.msk.f32.vlgmr.msra.gmra.mxu1 %vm364_vm1, %v3140_v57 }
 0x70c   :  { %v997_v61 = vpop.f32.mrf.mxu1 }
 0x70d   :  { %3149 = vmatprep.mubr.msk.f32.mxu1 %vm364_vm1, %v997_v61 }
 0x70e   :  { %3150 = vmatmul.mubr.msk.f32.gmra.mxu1 %vm364_vm1, %v3143_v60 }
 0x714   :  { %v3198_v62 = vpop.f32.mrf.mxu0 }
 0x715   :  { %v1604_v63 = vmul.f32 0.35355338, %v3198_v62 }
 0x716   :  { %v1584_v0 = vpop.f32.mrf.mxu0 }
 0x717   :  { %v1603_v3 = vmul.f32 0.35355338, %v1584_v0  ;;  %v1608_v4 = vadd.f32 %v1604_v63, %v3552_v45  ;;  %v349_v63 = vsub.s32 3, %v3455_v9  ;;  %v3786_v0 = vld [vmem:[%s4103_s6] sm:$0x3f] }
 0x718   :  { %v3201_v5 = vpop.f32.mrf.mxu0 }
 0x719   :  { %v1614_v6 = vsel %vm60_vm0, %v1608_v4, -inf  ;;  %v1607_v7 = vadd.f32 %v1603_v3, %v3557_v48  ;;  %v1606_v12 = vmul.f32 0.35355338, %v3201_v5  ;;  %v350_v3 = vrot.slane %v3786_v0, %v349_v63 }
 0x71a   :  { %v1594_v8 = vpop.f32.mrf.mxu0  ;;  %1615 = vmax.xlane.f32.xlu1 %v1614_v6 }
 0x71b   :  { %v1605_v13 = vmul.f32 0.35355338, %v1594_v8  ;;  %v1611_v14 = vsel %vm60_vm0, %v1607_v7, -inf  ;;  %v1610_v17 = vadd.f32 %v1606_v12, %v3571_v59  ;;  %v724_v6 = vadd.f32 %v3750_v53, %v350_v3 }
 0x71c   :  { %1612 = vmax.xlane.f32.xlu0 %v1611_v14  ;;  %v727_v12 = vadd.f32 %v3752_v54, %v350_v3 }
 0x71d   :  { %v1609_v15 = vadd.f32 %v1605_v13, %v3565_v55  ;;  %v1620_v45 = vsel %vm60_vm0, %v1610_v17, -inf }
 0x71f   :  { %v1617_v16 = vsel %vm60_vm0, %v1609_v15, -inf }
 0x720   :  { %1618 = vmax.xlane.f32.xlu0 %v1617_v16 }
 0x724   :  { %1621 = vmax.xlane.f32.xlu0 %v1620_v45 }
 0x752   :  { %v1261_v48 = vpop.xlane.xlu1 %1260 }
 0x754   :  { %v1258_v18 = vpop.xlane.xlu0 %1257 }
 0x755   :  { %3306 = vrcp.f32 %v1258_v18 }
 0x756   :  { %3308 = vrcp.f32 %v1261_v48 }
 0x758   :  { %v1264_v19 = vpop.xlane.xlu0 %1263 }
 0x759   :  { %3310 = vrcp.f32 %v1264_v19 }
 0x75c   :  { %v1283_v20 = vpop.permute.xlu0 %1282  ;;  %v1267_v21 = vpop.xlane.xlu1 %1266 }
 0x75d   :  { %3312 = vrcp.f32 %v1267_v21  ;;  %3166 = vmatprep.subr.mxu1 %v1283_v20 }
 0x75e   :  { %3167 = vmatpush3.msra.mxu1 %v1283_v20 }
 0x760   :  { %v1281_v55 = vpop.permute.xlu1 %1280 }
 0x761   :  { %3168 = vmatprep.subr.mxu1 %v1281_v55 }
 0x762   :  { %v3307_v22 = vpop.eup %3306  ;;  %3169 = vmatpush3.msra.mxu1 %v1281_v55 }
 0x763   :  { %v1269_v59 = vmul.f32 %v3307_v22, %v3301_v44  ;;  %v3309_v23 = vpop.eup %3308  ;;  %v345_v44 = vld [vmem:[%s4107_s9 + $0x10] sm:$0xff] }
 0x764   :  { %v1279_v11 = vpop.permute.xlu1 %1278  ;;  %v1271_v27 = vmul.f32 %v3309_v23, %v3731_v42 }
 0x765   :  { %3170 = vmatprep.subr.mxu1 %v1279_v11  ;;  %3174 = vmatprep.mubr.msk.f32.mxu1 %vm60_vm0, %v1269_v59 }
 0x766   :  { %3171 = vmatpush3.msra.mxu1 %v1279_v11  ;;  %v3311_v24 = vpop.eup %3310 }
 0x767   :  { %v1273_v32 = vmul.f32 %v3311_v24, %v3736_v47 }
 0x768   :  { %v1277_v25 = vpop.permute.xlu1 %1276 }
 0x769   :  { %3172 = vmatprep.subr.mxu1 %v1277_v25 }
 0x76a   :  { %v3313_v29 = vpop.eup %3312  ;;  %3173 = vmatpush3.msra.mxu1 %v1277_v25  ;;  %v346_v25 = vld [vmem:[%s4107_s9 + $0x18] sm:$0xff] }
 0x76b   :  { %3175 = vmatmul.mubr.msk.f32.vlgmr.msra.gmra.mxu1 %vm60_vm0, %v1271_v27  ;;  %v1275_v33 = vmul.f32 %v3313_v29, %v3740_v50  ;;  %3180 = vmatprep.subr.mxu1 %v345_v44 }
 0x76c   :  { %3177 = vmatprep.mubr.msk.f32.mxu1 %vm60_vm0, %v1273_v32  ;;  %3181 = vmatpush3.msra.mxu1 %v345_v44 }
 0x76f   :  { %3178 = vmatmul.mubr.msk.f32.gmra.mxu1 %vm60_vm0, %v1275_v33  ;;  %v726_v33 = vadd.f32 %v3754_v56, %v350_v3 }
 0x7a3   :  { %v1616_v34 = vpop.xlane.xlu1 %1615 }
 0x7a4   :  { %v1624_v35 = vsub.f32 %v1608_v4, %v1616_v34  ;;  %v725_v4 = vadd.f32 %v3748_v52, %v350_v3 }
 0x7a5   :  { %v1613_v36 = vpop.xlane.xlu0 %1612 }
 0x7a6   :  { %v1629_v37 = vmul.f32 1.442695, %v1624_v35  ;;  %v1623_v38 = vsub.f32 %v1607_v7, %v1613_v36 }
 0x7a8   :  { %3314 = vpow2.f32 %v1629_v37  ;;  %v1627_v39 = vmul.f32 1.442695, %v1623_v38 }
 0x7a9   :  { %v1619_v40 = vpop.xlane.xlu0 %1618 }
 0x7aa   :  { %3316 = vpow2.f32 %v1627_v39  ;;  %v1625_v41 = vsub.f32 %v1609_v15, %v1619_v40 }
 0x7ac   :  { %v1631_v42 = vmul.f32 1.442695, %v1625_v41 }
 0x7ad   :  { %v1622_v43 = vpop.xlane.xlu0 %1621 }
 0x7ae   :  { %3318 = vpow2.f32 %v1631_v42  ;;  %v1626_v46 = vsub.f32 %v1610_v17, %v1622_v43 }
 0x7b0   :  { %v1633_v47 = vmul.f32 1.442695, %v1626_v46 }
 0x7b2   :  { %3320 = vpow2.f32 %v1633_v47 }
 0x7b5   :  { %v3315_v49 = vpop.eup %3314 }
 0x7b6   :  { %v1638_v50 = vsel %vm60_vm0, %v3315_v49, 0.0 }
 0x7b7   :  { %v3317_v51 = vpop.eup %3316  ;;  %1639 = vadd.xlane.f32.xlu1 %v1638_v50 }
 0x7b8   :  { %v1635_v57 = vsel %vm60_vm0, %v3317_v51, 0.0 }
 0x7b9   :  { %1636 = vadd.xlane.f32.xlu0 %v1635_v57 }
 0x7bb   :  { %v3319_v58 = vpop.eup %3318 }
 0x7bc   :  { %v1641_v60 = vsel %vm60_vm0, %v3319_v58, 0.0 }
 0x7bd   :  { %1642 = vadd.xlane.f32.xlu0 %v1641_v60 }
 0x7bf   :  { %v3321_v61 = vpop.eup %3320 }
 0x7c0   :  { %v1644_v62 = vsel %vm60_vm0, %v3321_v61, 0.0 }
 0x7c1   :  { %1645 = vadd.xlane.f32.xlu1 %v1644_v62 }
 0x7ca   :  { %v3148_v5 = vpop.f32.mrf.mxu1 }
 0x7cb   :  { %v1104_v7 = vadd.f32 %v3148_v5, %v725_v4 }
 0x7cc   :  { %v1084_v8 = vpop.f32.mrf.mxu1 }
 0x7cd   :  { %v1103_v13 = vadd.f32 %v1084_v8, %v724_v6 }
 0x7ce   :  { %v3151_v14 = vpop.f32.mrf.mxu1 }
 0x7cf   :  { %v1106_v15 = vadd.f32 %v3151_v14, %v727_v12 }
 0x7d0   :  { %v1094_v52 = vpop.f32.mrf.mxu1 }
 0x7d1   :  { %v1105_v36 = vadd.f32 %v1094_v52, %v726_v33 }
 0x7d2   :  { %1659 = vrot.lane.b32.xlu1 %v3507_v30, %s3349_s26 }
 0x7d3   :  { %1661 = vrot.lane.b32.xlu0 %v3503_v28, %s3349_s26 }
 0x7d6   :  { %1657 = vrot.lane.b32.xlu1 %v3511_v31, %s3349_s26 }
 0x7da   :  { %1655 = vrot.lane.b32.xlu1 %v3501_v26, %s3349_s26 }
 0x82b   :  { %v3176_v16 = vpop.f32.mrf.mxu1 }
 0x82d   :  { %v1366_v17 = vpop.f32.mrf.mxu1 }
 0x82e   :  { %3182 = vmatprep.mubr.msk.f32.mxu1 %vm364_vm1, %v1366_v17 }
 0x82f   :  { %v3179_v53 = vpop.f32.mrf.mxu1  ;;  %3183 = vmatmul.mubr.msk.f32.vlgmr.msra.gmra.mxu1 %vm364_vm1, %v3176_v16 }
 0x831   :  { %v1376_v54 = vpop.f32.mrf.mxu1 }
 0x832   :  { %3185 = vmatprep.mubr.msk.f32.mxu1 %vm364_vm1, %v1376_v54 }
 0x833   :  { %3186 = vmatmul.mubr.msk.f32.gmra.mxu1 %vm364_vm1, %v3179_v53 }
 0x840   :  { %v1640_v28 = vpop.xlane.xlu1 %1639 }
 0x842   :  { %v1637_v30 = vpop.xlane.xlu0 %1636 }
 0x843   :  { %3322 = vrcp.f32 %v1637_v30 }
 0x844   :  { %3324 = vrcp.f32 %v1640_v28 }
 0x846   :  { %v1643_v45 = vpop.xlane.xlu0 %1642 }
 0x847   :  { %3326 = vrcp.f32 %v1643_v45 }
 0x84a   :  { %v1662_v26 = vpop.permute.xlu0 %1661  ;;  %v1646_v31 = vpop.xlane.xlu1 %1645 }
 0x84b   :  { %3328 = vrcp.f32 %v1646_v31  ;;  %3202 = vmatprep.subr.mxu1 %v1662_v26 }
 0x84c   :  { %3203 = vmatpush3.msra.mxu1 %v1662_v26 }
 0x84e   :  { %v1660_v18 = vpop.permute.xlu1 %1659 }
 0x84f   :  { %3204 = vmatprep.subr.mxu1 %v1660_v18 }
 0x850   :  { %v3323_v48 = vpop.eup %3322  ;;  %3205 = vmatpush3.msra.mxu1 %v1660_v18  ;;  %v1933_v18 = vld [vmem:[%s4108_s10] sm:$0xff] }
 0x851   :  { %v1648_v19 = vmul.f32 %v3323_v48, %v3317_v51  ;;  %v3325_v21 = vpop.eup %3324  ;;  %3232 = vmatprep.mubr.msk.f32.mxu0 %vm60_vm0, %v1933_v18  ;;  %v2091_v48 = vld [vmem:[%s4109_s3 + $0x28] sm:$0x1f] }
 0x852   :  { %v1658_v20 = vpop.permute.xlu1 %1657  ;;  %v1650_v59 = vmul.f32 %v3325_v21, %v3315_v49  ;;  %v3350_v21 = vmov 0.0   ;;  %v2222_v18 = vld [vmem:[%s4111_s4 + $0xa8] sm:$0xff] }
 0x853   :  { %3206 = vmatprep.subr.mxu1 %v1658_v20  ;;  %3210 = vmatprep.mubr.msk.f32.mxu1 %vm60_vm0, %v1648_v19  ;;  %v2090_v19 = vld [vmem:[%s4109_s3 + $0x20] sm:$0x1f] }
 0x854   :  { %3207 = vmatpush3.msra.mxu1 %v1658_v20  ;;  %v3327_v55 = vpop.eup %3326  ;;  %v2089_v20 = vld [vmem:[%s4109_s3 + $0x18] sm:$0xff] }
 0x855   :  { %v1652_v23 = vmul.f32 %v3327_v55, %v3319_v58  ;;  %v2088_v55 = vld [vmem:[%s4109_s3 + $0x10] sm:$0xff] }
 0x856   :  { %v1656_v22 = vpop.permute.xlu1 %1655 }
 0x857   :  { %3208 = vmatprep.subr.mxu1 %v1656_v22 }
 0x858   :  { %v3329_v11 = vpop.eup %3328  ;;  %3209 = vmatpush3.msra.mxu1 %v1656_v22  ;;  %v2087_v22 = vld [vmem:[%s4109_s3 + $0x8] sm:$0xff] }
 0x859   :  { %3211 = vmatmul.mubr.msk.f32.vlgmr.msra.gmra.mxu1 %vm60_vm0, %v1650_v59  ;;  %v1654_v24 = vmul.f32 %v3329_v11, %v3321_v61  ;;  %3216 = vmatprep.subr.mxu1 %v346_v25  ;;  %v2086_v59 = vld [vmem:[%s4109_s3] sm:$0xff] }
 0x85a   :  { %3213 = vmatprep.mubr.msk.f32.mxu1 %vm60_vm0, %v1652_v23  ;;  %3217 = vmatpush3.msra.mxu1 %v346_v25  ;;  %v2082_v11 = vld [vmem:[%s4110_s11] sm:$0xff]  ;;  %v2083_v23 = vld [vmem:[%s4110_s11 + $0x8] sm:$0xff] }
 0x85b   :  { %2916 = vmatprep.subr.msk.mxu1 %vm2105_vm2, %v2091_v48  ;;  %v2224_v48 = vld [vmem:[%s4111_s4 + $0xb8] sm:$0xff] }
 0x85d   :  { %3214 = vmatmul.mubr.msk.f32.gmra.mxu1 %vm60_vm0, %v1654_v24 }
 0x8ef   :  { %v3184_v27 = vpop.f32.mrf.mxu1 }
 0x8f0   :  { %v1483_v29 = vadd.f32 %v3184_v27, %v1104_v7 }
 0x8f1   :  { %v1463_v32 = vpop.f32.mrf.mxu1 }
 0x8f2   :  { %v1482_v34 = vadd.f32 %v1463_v32, %v1103_v13 }
 0x8f3   :  { %v3187_v35 = vpop.f32.mrf.mxu1 }
 0x8f4   :  { %v1485_v37 = vadd.f32 %v3187_v35, %v1106_v15 }
 0x8f5   :  { %v1473_v38 = vpop.f32.mrf.mxu1 }
 0x8f6   :  { %v1484_v39 = vadd.f32 %v1473_v38, %v1105_v36 }
 0x919   :  { %v3212_v40 = vpop.f32.mrf.mxu1 }
 0x91b   :  { %v1745_v41 = vpop.f32.mrf.mxu1 }
 0x91c   :  { %3218 = vmatprep.mubr.msk.f32.mxu1 %vm364_vm1, %v1745_v41  ;;  %v1927_v41 = vsub.s32 5, %v3455_v9 }
 0x91d   :  { %v3215_v42 = vpop.f32.mrf.mxu1  ;;  %3219 = vmatmul.mubr.msk.f32.vlgmr.msra.gmra.mxu1 %vm364_vm1, %v3212_v40  ;;  %v1919_v40 = vsub.s32 4, %v3455_v9 }
 0x91e   :  { %2917 = vmatpush1.msk.msra.mxu1 %vm2105_vm2, %v2090_v19  ;;  %v2221_v19 = vld [vmem:[%s4111_s4 + $0xa0] sm:$0xff] }
 0x91f   :  { %v1755_v43 = vpop.f32.mrf.mxu1  ;;  %2140 = vmatprep.subr.mxu1 %v2089_v20  ;;  %v2223_v20 = vld [vmem:[%s4111_s4 + $0xb0] sm:$0xff] }
 0x920   :  { %3221 = vmatprep.mubr.msk.f32.mxu1 %vm364_vm1, %v1755_v43  ;;  %2141 = vmatpush1.msra.mxu1 %v2088_v55  ;;  %v2218_v55 = vld [vmem:[%s4111_s4 + $0x88] sm:$0xff] }
 0x921   :  { %3222 = vmatmul.mubr.msk.f32.gmra.mxu1 %vm364_vm1, %v3215_v42  ;;  %2142 = vmatprep.subr.mxu1 %v2087_v22  ;;  %v1920_v42 = vrot.slane %v3786_v0, %v1919_v40  ;;  %v2220_v22 = vld [vmem:[%s4111_s4 + $0x98] sm:$0xff]  ;;  %v2209_v40 = vld [vmem:[%s4111_s4 + $0x40] sm:$0xff] }
 0x922   :  { %2176 = vmatprep.mubr.f32.mxu1 %v3350_v21  ;;  %2143 = vmatpush1.msra.mxu1 %v2086_v59  ;;  %v2217_v59 = vld [vmem:[%s4111_s4 + $0x80] sm:$0xff] }
 0x925   :  { %2918 = vmatmul.mubr.msk.f32.vlgmr.msra.gmra.mxu1 %vm2092_vm3, %v2082_v11  ;;  %v2219_v11 = vld [vmem:[%s4111_s4 + $0x90] sm:$0xff] }
 0x926   :  { %2182 = vmatprep.mubr.f32.mxu1 %v3350_v21 }
 0x929   :  { %2919 = vmatmul.mubr.msk.f32.gmra.mxu1 %vm2092_vm3, %v2083_v23  ;;  %v2214_v23 = vld [vmem:[%s4111_s4 + $0x68] sm:$0xff] }
 0x92a   :  { %2188 = vmatprep.mubr.f32.mxu1 %v3350_v21 }
 0x9dd   :  { %v3220_v44 = vpop.f32.mrf.mxu1 }
 0x9de   :  { %v1862_v50 = vadd.f32 %v3220_v44, %v1483_v29 }
 0x9df   :  { %v1842_v56 = vpop.f32.mrf.mxu1 }
 0x9e0   :  { %v1861_v60 = vadd.f32 %v1842_v56, %v1482_v34  ;;  %v1868_v61 = vsel %vm60_vm0, %v1862_v50, 0.0  ;;  %v1928_v56 = vrot.slane %v3786_v0, %v1927_v41  ;;  %v2211_v41 = vld [vmem:[%s4111_s4 + $0x50] sm:$0xff] }
 0x9e1   :  { %v3223_v46 = vpop.f32.mrf.mxu1 }
 0x9e2   :  { %v1864_v47 = vadd.f32 %v3223_v46, %v1485_v37  ;;  %v1865_v62 = vsel %vm60_vm0, %v1861_v60, 0.0 }
 0x9e3   :  { %v1852_v49 = vpop.f32.mrf.mxu1 }
 0x9e4   :  { %v1863_v51 = vadd.f32 %v1852_v49, %v1484_v39  ;;  %v1874_v57 = vsel %vm60_vm0, %v1864_v47, 0.0 }
 0x9e5   :  { %1875 = vadd.xlane.f32.xlu0 %v1874_v57 }
 0x9e6   :  { %v1871_v58 = vsel %vm60_vm0, %v1863_v51, 0.0 }
 0x9e7   :  { %1872 = vadd.xlane.f32.xlu1 %v1871_v58 }
 0x9e9   :  { %1869 = vadd.xlane.f32.xlu0 %v1868_v61 }
 0x9ed   :  { %1866 = vadd.xlane.f32.xlu0 %v1865_v62 }
 0xa6e   :  { %v1876_v3 = vpop.xlane.xlu0 %1875 }
 0xa6f   :  { %v1880_v4 = vmul.f32 0.03125, %v1876_v3 }
 0xa70   :  { %v1873_v5 = vpop.xlane.xlu1 %1872 }
 0xa71   :  { %v3818_v6 = vsub.f32 %v1864_v47, %v1880_v4  ;;  %v1879_v7 = vmul.f32 0.03125, %v1873_v5 }
 0xa72   :  { %v1870_v8 = vpop.xlane.xlu0 %1869 }
 0xa73   :  { %v3820_v12 = vsub.f32 %v1863_v51, %v1879_v7  ;;  %v1878_v13 = vmul.f32 0.03125, %v1870_v8  ;;  %v1888_v14 = vmul.f32 %v3818_v6, %v3818_v6  ;;  %v1935_v7 = vld [vmem:[%s4108_s10 + $0x10] sm:$0xff]  ;;  %v1936_v8 = vld [vmem:[%s4108_s10 + $0x18] sm:$0xff] }
 0xa75   :  { %v3824_v15 = vsub.f32 %v1862_v50, %v1878_v13  ;;  %v1898_v52 = vsel %vm60_vm0, %v1888_v14, 0.0  ;;  %v1887_v16 = vmul.f32 %v3820_v12, %v3820_v12  ;;  %v1938_v13 = vld [vmem:[%s4108_s10 + $0x28] sm:$0xff]  ;;  %v1939_v14 = vld [vmem:[%s4108_s10 + $0x30] sm:$0xff] }
 0xa76   :  { %1899 = vadd.xlane.f32.xlu0 %v1898_v52  ;;  %v1867_v17 = vpop.xlane.xlu0 %1866  ;;  %v2084_v52 = vld [vmem:[%s4110_s11 + $0x10] sm:$0xff] }
 0xa77   :  { %v1877_v53 = vmul.f32 0.03125, %v1867_v17  ;;  %v1895_v54 = vsel %vm60_vm0, %v1887_v16, 0.0  ;;  %v1886_v30 = vmul.f32 %v3824_v15, %v3824_v15  ;;  %2920 = vmatmul.mubr.msk.f32.gmra.mxu1 %vm2092_vm3, %v2084_v52  ;;  %v2230_v16 = vld [vmem:[%s4111_s4 + $0xe8] sm:$0xff]  ;;  %v2232_v17 = vld [vmem:[%s4111_s4 + $0xf8] sm:$0xff] }
 0xa78   :  { %1896 = vadd.xlane.f32.xlu1 %v1895_v54  ;;  %2194 = vmatprep.mubr.f32.mxu1 %v3350_v21  ;;  %v2231_v54 = vld [vmem:[%s4111_s4 + $0xf0] sm:$0xff] }
 0xa79   :  { %v3832_v28 = vsub.f32 %v1861_v60, %v1877_v53  ;;  %v1892_v45 = vsel %vm60_vm0, %v1886_v30, 0.0  ;;  %2269 = vmatprep.subr.mxu1 %v2230_v16  ;;  %v2229_v53 = vld [vmem:[%s4111_s4 + $0xe0] sm:$0xff]  ;;  %v2085_v30 = vld [vmem:[%s4110_s11 + $0x18] sm:$0xff] }
 0xa7a   :  { %1893 = vadd.xlane.f32.xlu0 %v1892_v45  ;;  %2270 = vmatpush1.msra.mxu1 %v2229_v53  ;;  %v2228_v45 = vld [vmem:[%s4111_s4 + $0xd8] sm:$0xff] }
 0xa7b   :  { %v1885_v26 = vmul.f32 %v3832_v28, %v3832_v28  ;;  %2921 = vmatmul.mubr.msk.f32.gmra.mxu1 %vm2092_vm3, %v2085_v30 }
 0xa7c   :  { %2309 = vmatprep.mubr.f32.mxu1 %v3350_v21 }
 0xa7d   :  { %v1889_v31 = vsel %vm60_vm0, %v1885_v26, 0.0  ;;  %v2225_v26 = vld [vmem:[%s4111_s4 + $0xc0] sm:$0xff] }
 0xa7e   :  { %1890 = vadd.xlane.f32.xlu1 %v1889_v31  ;;  %v2227_v31 = vld [vmem:[%s4111_s4 + $0xd0] sm:$0xff] }
 0xaff   :  { %v1900_v24 = vpop.xlane.xlu0 %1899 }
 0xb00   :  { %v1904_v25 = vmul.f32 0.03125, %v1900_v24  ;;  %v2216_v24 = vld [vmem:[%s4111_s4 + $0x78] sm:$0xff] }
 0xb01   :  { %v1897_v27 = vpop.xlane.xlu1 %1896 }
 0xb02   :  { %v1908_v29 = vadd.f32 1e-05, %v1904_v25  ;;  %v1903_v32 = vmul.f32 0.03125, %v1897_v27 }
 0xb03   :  { %v1894_v33 = vpop.xlane.xlu0 %1893 }
 0xb04   :  { %3330 = vrsqrt.f32 %v1908_v29  ;;  %v1907_v34 = vadd.f32 1e-05, %v1903_v32  ;;  %v1902_v35 = vmul.f32 0.03125, %v1894_v33 }
 0xb06   :  { %3332 = vrsqrt.f32 %v1907_v34  ;;  %v1906_v36 = vadd.f32 1e-05, %v1902_v35  ;;  %v2213_v35 = vld [vmem:[%s4111_s4 + $0x60] sm:$0xff] }
 0xb07   :  { %v1891_v37 = vpop.xlane.xlu1 %1890 }
 0xb08   :  { %3334 = vrsqrt.f32 %v1906_v36  ;;  %v1901_v38 = vmul.f32 0.03125, %v1891_v37  ;;  %v2215_v36 = vld [vmem:[%s4111_s4 + $0x70] sm:$0xff]  ;;  %v2210_v37 = vld [vmem:[%s4111_s4 + $0x48] sm:$0xff] }
 0xb0a   :  { %v1905_v39 = vadd.f32 1e-05, %v1901_v38  ;;  %v2212_v38 = vld [vmem:[%s4111_s4 + $0x58] sm:$0xff] }
 0xb0c   :  { %3336 = vrsqrt.f32 %v1905_v39 }
 0xb11   :  { %v3331_v43 = vpop.eup %3330 }
 0xb12   :  { %v1916_v44 = vmul.f32 %v3331_v43, %v3818_v6  ;;  %v1934_v6 = vld [vmem:[%s4108_s10 + $0x8] sm:$0xff]  ;;  %v2208_v43 = vld [vmem:[%s4111_s4 + $0x38] sm:$0xff] }
 0xb13   :  { %v3333_v46 = vpop.eup %3332 }
 0xb14   :  { %v1924_v47 = vmul.f32 %v1920_v42, %v1916_v44  ;;  %v1915_v49 = vmul.f32 %v3333_v46, %v3820_v12  ;;  %v1937_v12 = vld [vmem:[%s4108_s10 + $0x20] sm:$0xff]  ;;  %v2207_v46 = vld [vmem:[%s4111_s4 + $0x30] sm:$0xff] }
 0xb15   :  { %v3335_v50 = vpop.eup %3334 }
 0xb16   :  { %v1932_v51 = vadd.f32 %v1928_v56, %v1924_v47  ;;  %v1923_v57 = vmul.f32 %v1920_v42, %v1915_v49  ;;  %v1914_v58 = vmul.f32 %v3335_v50, %v3824_v15  ;;  %v1940_v15 = vld [vmem:[%s4108_s10 + $0x38] sm:$0xff]  ;;  %v2202_v47 = vld [vmem:[%s4111_s4 + $0x8] sm:$0xff]  ;;  %v2201_v50 = vld [vmem:[%s4111_s4] sm:$0xff] }
 0xb17   :  { %v2204_v49 = vld [vmem:[%s4111_s4 + $0x18] sm:$0xff] }
 0xb18   :  { %3224 = vmatprep.subr.msk.mxu0 %vm60_vm0, %v1932_v51  ;;  %v1931_v60 = vadd.f32 %v1928_v56, %v1923_v57  ;;  %v1922_v61 = vmul.f32 %v1920_v42, %v1914_v58  ;;  %v3351_v57 = vmov 0   ;;  %v2646_v58 = vld [vmem:[%s4112_s13] sm:$0x1f] }
 0xb19   :  { %v3337_v62 = vpop.eup %3336  ;;  %3225 = vmatpush3.xpose.msk.msra.mxu0 %vm60_vm0, %v1932_v51  ;;  %v2203_v51 = vld [vmem:[%s4111_s4 + $0x10] sm:$0xff]  ;;  %3257 = vset.pattern.permute.xlu0 %v3351_v57 }
 0xb1a   :  { %3226 = vmatprep.subr.msk.mxu0 %vm60_vm0, %v1931_v60  ;;  %v1913_v0 = vmul.f32 %v3337_v62, %v3832_v28  ;;  %v1930_v3 = vadd.f32 %v1928_v56, %v1922_v61  ;;  %v2226_v28 = vld [vmem:[%s4111_s4 + $0xc8] sm:$0xff]  ;;  %2649 = vperm.xlu0 %3257, %v2646_v58  }
 0xb1b   :  { %2271 = vmatprep.subr.mxu1 %v2226_v28 }
 0xb1c   :  { %v1921_v4 = vmul.f32 %v1920_v42, %v1913_v0  ;;  %2272 = vmatpush1.msra.mxu1 %v2225_v26  ;;  %v2206_v42 = vld [vmem:[%s4111_s4 + $0x28] sm:$0xff] }
 0xb1d   :  { %3227 = vmatpush3.xpose.msk.msra.mxu0 %vm60_vm0, %v1931_v60  ;;  %2273 = vmatprep.subr.mxu1 %v2222_v18  ;;  %v4061_v60 = vpop.f32.mrf.mxu1 }
 0xb1e   :  { %3228 = vmatprep.subr.msk.mxu0 %vm60_vm0, %v1930_v3  ;;  %v1929_v5 = vadd.f32 %v1928_v56, %v1921_v4  ;;  %2274 = vmatpush1.msra.mxu1 %v2221_v19  ;;  %v2205_v56 = vld [vmem:[%s4111_s4 + $0x20] sm:$0xff] }
 0xb1f   :  { %2275 = vmatprep.subr.mxu1 %v2218_v55  ;;  %v4063_v61 = vpop.f32.mrf.mxu1 }
 0xb20   :  { %2276 = vmatpush1.msra.mxu1 %v2217_v59 }
 0xb21   :  { %3229 = vmatpush3.xpose.msk.msra.mxu0 %vm60_vm0, %v1930_v3  ;;  %2459 = vmatprep.subr.mxu1 %v2214_v23  ;;  %v4065_v62 = vpop.f32.mrf.mxu1 }
 0xb22   :  { %3230 = vmatprep.subr.msk.mxu0 %vm60_vm0, %v1929_v5 }
 0xb23   :  { %v2186_v0 = vpop.f32.mrf.mxu1 }
 0xb25   :  { %3231 = vmatpush3.xpose.msk.msra.mxu0 %vm60_vm0, %v1929_v5 }
 0xb26   :  { %2358 = vmatprep.subr.mxu0 %v2232_v17 }
 0xb28   :  { %3233 = vmatmul.mubr.msk.f32.vlgmr.msra.gmra.mxu0 %vm60_vm0, %v1934_v6 }
 0xb29   :  { %3235 = vmatprep.mubr.msk.f32.mxu0 %vm60_vm0, %v1935_v7  ;;  %2359 = vmatpush1.msra.mxu0 %v2231_v54 }
 0xb2a   :  { %2360 = vmatprep.subr.mxu0 %v2228_v45 }
 0xb2b   :  { %2361 = vmatpush1.msra.mxu0 %v2227_v31 }
 0xb2c   :  { %3236 = vmatmul.mubr.msk.f32.gmra.mxu0 %vm60_vm0, %v1936_v8  ;;  %2362 = vmatprep.subr.mxu0 %v2224_v48 }
 0xb2d   :  { %3238 = vmatprep.mubr.msk.f32.mxu0 %vm60_vm0, %v1937_v12  ;;  %2363 = vmatpush1.msra.mxu0 %v2223_v20 }
 0xb2e   :  { %2364 = vmatprep.subr.mxu0 %v2220_v22 }
 0xb2f   :  { %2365 = vmatpush1.msra.mxu0 %v2219_v11 }
 0xb30   :  { %3239 = vmatmul.mubr.msk.f32.gmra.mxu0 %vm60_vm0, %v1938_v13  ;;  %2548 = vmatprep.subr.mxu0 %v2216_v24 }
 0xb31   :  { %3241 = vmatprep.mubr.msk.f32.mxu0 %vm60_vm0, %v1939_v14 }
 0xb34   :  { %3242 = vmatmul.mubr.msk.f32.gmra.mxu0 %vm60_vm0, %v1940_v15 }
 0xb35   :  { %2398 = vmatprep.mubr.f32.mxu0 %v3350_v21 }
 0xb37   :  { %v2190_v3 = vpop.f32.mrf.mxu1 }
 0xb39   :  { %v2192_v4 = vpop.f32.mrf.mxu1 }
 0xb3b   :  { %v2196_v5 = vpop.f32.mrf.mxu1 }
 0xb3d   :  { %v2198_v6 = vpop.f32.mrf.mxu1 }
 0xbe8   :  { %v3234_v25 = vpop.f32.mrf.mxu0 }
 0xbea   :  { %v2043_v27 = vpop.f32.mrf.mxu0 }
 0xbec   :  { %v3980_v29 = vpop.f32.mrf.mxu0 }
 0xbee   :  { %v2053_v32 = vpop.f32.mrf.mxu0 }
 0xbf0   :  { %v3240_v33 = vpop.f32.mrf.mxu0 }
 0xbf2   :  { %v2063_v34 = vpop.f32.mrf.mxu0 }
 0xbf3   :  { %2922 = vmatmul.mubr.msk.f32.vlgmr.msra.gmra.mxu1 %vm60_vm0, %v2063_v34  ;;  %2926 = vmatmul.mubr.msk.f32.vlgmr.msra.gmra.mxu0 %vm60_vm0, %v2063_v34 }
 0xbf4   :  { %2315 = vmatprep.mubr.f32.mxu1 %v3350_v21  ;;  %2404 = vmatprep.mubr.f32.mxu0 %v3350_v21  ;;  %v3243_v39 = vpop.f32.mrf.mxu0 }
 0xbf5   :  { %2460 = vmatpush1.msra.mxu1 %v2213_v35  ;;  %2549 = vmatpush1.msra.mxu0 %v2215_v36 }
 0xbf6   :  { %2461 = vmatprep.subr.mxu1 %v2210_v37  ;;  %2550 = vmatprep.subr.mxu0 %v2212_v38  ;;  %v2073_v44 = vpop.f32.mrf.mxu0 }
 0xbf7   :  { %2923 = vmatmul.mubr.msk.f32.gmra.mxu1 %vm60_vm0, %v3240_v33  ;;  %2927 = vmatmul.mubr.msk.f32.gmra.mxu0 %vm60_vm0, %v3240_v33 }
 0xbf8   :  { %2321 = vmatprep.mubr.f32.mxu1 %v3350_v21  ;;  %2410 = vmatprep.mubr.f32.mxu0 %v3350_v21 }
 0xbf9   :  { %2462 = vmatpush1.msra.mxu1 %v2209_v40  ;;  %2551 = vmatpush1.msra.mxu0 %v2211_v41 }
 0xbfa   :  { %2463 = vmatprep.subr.mxu1 %v2206_v42  ;;  %2552 = vmatprep.subr.mxu0 %v2208_v43 }
 0xbfb   :  { %2924 = vmatmul.mubr.msk.f32.gmra.mxu1 %vm60_vm0, %v2073_v44  ;;  %2928 = vmatmul.mubr.msk.f32.gmra.mxu0 %vm60_vm0, %v2073_v44 }
 0xbfc   :  { %2327 = vmatprep.mubr.f32.mxu1 %v3350_v21  ;;  %2416 = vmatprep.mubr.f32.mxu0 %v3350_v21 }
 0xbfd   :  { %2464 = vmatpush1.msra.mxu1 %v2205_v56  ;;  %2553 = vmatpush1.msra.mxu0 %v2207_v46 }
 0xbfe   :  { %2465 = vmatprep.subr.mxu1 %v2202_v47  ;;  %2554 = vmatprep.subr.mxu0 %v2204_v49 }
 0xbff   :  { %2925 = vmatmul.mubr.msk.f32.gmra.mxu1 %vm60_vm0, %v3243_v39  ;;  %2929 = vmatmul.mubr.msk.f32.gmra.mxu0 %vm60_vm0, %v3243_v39 }
 0xc00   :  { %2466 = vmatpush1.msra.mxu1 %v2201_v50  ;;  %2499 = vmatprep.mubr.f32.mxu1 %v3350_v21 }
 0xc01   :  { %2555 = vmatpush1.msra.mxu0 %v2203_v51  ;;  %2588 = vmatprep.mubr.f32.mxu0 %v3350_v21 }
 0xc03   :  { %2930 = vmatmul.mubr.msk.f32.vlgmr.msra.gmra.mxu1 %vm60_vm0, %v2043_v27  ;;  %2934 = vmatmul.mubr.msk.f32.vlgmr.msra.gmra.mxu0 %vm60_vm0, %v2043_v27 }
 0xc04   :  { %2505 = vmatprep.mubr.f32.mxu1 %v3350_v21  ;;  %2594 = vmatprep.mubr.f32.mxu0 %v3350_v21 }
 0xc07   :  { %2931 = vmatmul.mubr.msk.f32.gmra.mxu1 %vm60_vm0, %v3234_v25  ;;  %2935 = vmatmul.mubr.msk.f32.gmra.mxu0 %vm60_vm0, %v3234_v25 }
 0xc08   :  { %2511 = vmatprep.mubr.f32.mxu1 %v3350_v21  ;;  %2600 = vmatprep.mubr.f32.mxu0 %v3350_v21 }
 0xc0b   :  { %2932 = vmatmul.mubr.msk.f32.gmra.mxu1 %vm60_vm0, %v2053_v32  ;;  %2936 = vmatmul.mubr.msk.f32.gmra.mxu0 %vm60_vm0, %v2053_v32 }
 0xc0c   :  { %2517 = vmatprep.mubr.f32.mxu1 %v3350_v21  ;;  %2606 = vmatprep.mubr.f32.mxu0 %v3350_v21 }
 0xc0f   :  { %2933 = vmatmul.mubr.msk.f32.gmra.mxu1 %vm60_vm0, %v3980_v29  ;;  %2937 = vmatmul.mubr.msk.f32.gmra.mxu0 %vm60_vm0, %v3980_v29 }
 0xc10   :  { %2719 = vmatprep.mubr.f32.mxu1 %v3350_v21  ;;  %2790 = vmatprep.mubr.f32.mxu0 %v3350_v21 }
 0xcb3   :  { %v2311_v7 = vpop.f32.mrf.mxu1  ;;  %v2400_v21 = vpop.f32.mrf.mxu0 }
 0xcb5   :  { %v2313_v8 = vpop.f32.mrf.mxu1  ;;  %v2402_v12 = vpop.f32.mrf.mxu0 }
 0xcb7   :  { %v2317_v13 = vpop.f32.mrf.mxu1  ;;  %v2406_v14 = vpop.f32.mrf.mxu0 }
 0xcb9   :  { %v2319_v15 = vpop.f32.mrf.mxu1  ;;  %v2408_v52 = vpop.f32.mrf.mxu0 }
 0xcbb   :  { %v2323_v16 = vpop.f32.mrf.mxu1  ;;  %v2412_v17 = vpop.f32.mrf.mxu0 }
 0xcbd   :  { %v2325_v53 = vpop.f32.mrf.mxu1  ;;  %v2414_v54 = vpop.f32.mrf.mxu0 }
 0xcbf   :  { %v2329_v30 = vpop.f32.mrf.mxu1  ;;  %v2418_v28 = vpop.f32.mrf.mxu0 }
 0xcc1   :  { %v2331_v45 = vpop.f32.mrf.mxu1  ;;  %v2420_v26 = vpop.f32.mrf.mxu0 }
 0xcc3   :  { %v2501_v31 = vpop.f32.mrf.mxu1  ;;  %v2590_v18 = vpop.f32.mrf.mxu0 }
 0xcc5   :  { %v2503_v48 = vpop.f32.mrf.mxu1  ;;  %v2592_v19 = vpop.f32.mrf.mxu0 }
 0xcc6   :  { %v2504_v36 = vadd.f32 %v2503_v48, %v2313_v8  ;;  %v2593_v37 = vadd.f32 %v2592_v19, %v2402_v12 }
 0xcc7   :  { %v2507_v20 = vpop.f32.mrf.mxu1  ;;  %v2596_v55 = vpop.f32.mrf.mxu0 }
 0xcc8   :  { %v2508_v46 = vadd.f32 %v2507_v20, %v2317_v13  ;;  %v2597_v47 = vadd.f32 %v2596_v55, %v2406_v14 }
 0xcc9   :  { %v2509_v22 = vpop.f32.mrf.mxu1  ;;  %v2598_v59 = vpop.f32.mrf.mxu0 }
 0xcca   :  { %v2510_v42 = vadd.f32 %v2509_v22, %v2319_v15  ;;  %v2599_v43 = vadd.f32 %v2598_v59, %v2408_v52  ;;  %v2617_v15 = vadd.f32 %v2508_v46, %v4065_v62  ;;  %v2619_v52 = vadd.f32 %v2597_v47, %v4065_v62  ;;  %v2797_v22 = vld [vmem:[%s4114_s2] sm:$0xf]  ;;  %v2650_v59 = vpop.permute.xlu0 %2649 }
 0xccb   :  { %v2513_v11 = vpop.f32.mrf.mxu1  ;;  %v2602_v23 = vpop.f32.mrf.mxu0 }
 0xccc   :  { %v2514_v38 = vadd.f32 %v2513_v11, %v2323_v16  ;;  %v2603_v39 = vadd.f32 %v2602_v23, %v2412_v17  ;;  %v2618_v16 = vadd.f32 %v2510_v42, %v2186_v0  ;;  %v2620_v17 = vadd.f32 %v2599_v43, %v2186_v0 }
 0xccd   :  { %v2515_v24 = vpop.f32.mrf.mxu1  ;;  %v2604_v25 = vpop.f32.mrf.mxu0  ;;  %v2802_v11 = vrot.slane %v2797_v22, %v58_v10  ;;  %v2810_v23 = vrot.slane %v2797_v22, %v225_v2 }
 0xcce   :  { %v2516_v32 = vadd.f32 %v2515_v24, %v2325_v53  ;;  %v2605_v33 = vadd.f32 %v2604_v25, %v2414_v54  ;;  %v2502_v54 = vadd.f32 %v2501_v31, %v2311_v7  ;;  %v2621_v8 = vadd.f32 %v2514_v38, %v2190_v3 }
 0xccf   :  { %v2519_v27 = vpop.f32.mrf.mxu1  ;;  %v2608_v29 = vpop.f32.mrf.mxu0  ;;  %v2623_v12 = vadd.f32 %v2603_v39, %v2190_v3  ;;  %v2636_v62 = vmax.f32 %v2620_v17, 0.0  ;;  %v2633_v31 = vmax.f32 %v2617_v15, 0.0 }
 0xcd0   :  { %v2520_v34 = vadd.f32 %v2519_v27, %v2329_v30  ;;  %v2609_v35 = vadd.f32 %v2608_v29, %v2418_v28  ;;  %v2622_v51 = vadd.f32 %v2516_v32, %v2192_v4  ;;  %v2624_v57 = vadd.f32 %v2605_v33, %v2192_v4 }
 0xcd1   :  { %v2521_v40 = vpop.f32.mrf.mxu1  ;;  %v2610_v41 = vpop.f32.mrf.mxu0  ;;  %v2591_v30 = vadd.f32 %v2590_v18, %v2400_v21  ;;  %v2616_v4 = vadd.f32 %v2593_v37, %v4063_v61  ;;  %v2613_v3 = vadd.f32 %v2502_v54, %v4061_v60  ;;  %v2637_v7 = vmax.f32 %v2621_v8, 0.0 }
 0xcd2   :  { %v2522_v44 = vadd.f32 %v2521_v40, %v2331_v45  ;;  %v2611_v56 = vadd.f32 %v2610_v41, %v2420_v26  ;;  %v2625_v49 = vadd.f32 %v2520_v34, %v2196_v5  ;;  %v2627_v50 = vadd.f32 %v2609_v35, %v2196_v5 }
 0xcd3   :  { %v2614_v5 = vadd.f32 %v2504_v36, %v4063_v61  ;;  %v2638_v45 = vmax.f32 %v2622_v51, 0.0  ;;  %v2615_v0 = vadd.f32 %v2591_v30, %v4061_v60  ;;  %v2639_v21 = vmax.f32 %v2623_v12, 0.0  ;;  %v2645_v60 = vld [vmem:[%s4113_s12] sm:$0x1f] }
 0xcd4   :  { %v2626_v58 = vadd.f32 %v2522_v44, %v2198_v6  ;;  %v2628_v53 = vadd.f32 %v2611_v56, %v2198_v6  ;;  %v2641_v13 = vmax.f32 %v2625_v49, 0.0  ;;  %v2643_v14 = vmax.f32 %v2627_v50, 0.0 }
 0xcd5   :  { %v2640_v6 = vmax.f32 %v2624_v57, 0.0  ;;  %v2634_v26 = vmax.f32 %v2618_v16, 0.0  ;;  %v2635_v18 = vmax.f32 %v2619_v52, 0.0  ;;  %v2630_v61 = vmax.f32 %v2614_v5, 0.0 }
 0xcd6   :  { %v2642_v28 = vmax.f32 %v2626_v58, 0.0  ;;  %v2644_v48 = vmax.f32 %v2628_v53, 0.0  ;;  %v2632_v19 = vmax.f32 %v2616_v4, 0.0  ;;  %v2629_v20 = vmax.f32 %v2613_v3, 0.0 }
 0xcd7   :  { %v2631_v55 = vmax.f32 %v2615_v0, 0.0  ;;  %v2806_v32 = vrot.slane %v2797_v22, %v217_v1  ;;  %v2814_v33 = vrot.slane %v2797_v22, %v349_v63 }
 0xcd8   :  { %2679 = vmatprep.subr.mxu1 %v2642_v28  ;;  %2750 = vmatprep.subr.mxu0 %v2644_v48 }
 0xcd9   :  { %2680 = vmatpush1.msra.mxu1 %v2641_v13  ;;  %2751 = vmatpush1.msra.mxu0 %v2643_v14 }
 0xcda   :  { %2681 = vmatprep.subr.mxu1 %v2638_v45  ;;  %2752 = vmatprep.subr.mxu0 %v2640_v6 }
 0xcdb   :  { %2682 = vmatpush1.msra.mxu1 %v2637_v7  ;;  %2753 = vmatpush1.msra.mxu0 %v2639_v21 }
 0xcdc   :  { %2683 = vmatprep.subr.mxu1 %v2634_v26  ;;  %2754 = vmatprep.subr.mxu0 %v2636_v62 }
 0xcdd   :  { %2684 = vmatpush1.msra.mxu1 %v2633_v31  ;;  %2755 = vmatpush1.msra.mxu0 %v2635_v18 }
 0xcde   :  { %2685 = vmatprep.subr.mxu1 %v2630_v61  ;;  %2756 = vmatprep.subr.mxu0 %v2632_v19 }
 0xcdf   :  { %2686 = vmatpush1.msra.mxu1 %v2629_v20  ;;  %2757 = vmatpush1.msra.mxu0 %v2631_v55 }
 0xce0   :  { %2938 = vmatmul.mubr.msk.f32.vlgmr.msra.gmra.mxu1 %vm60_vm0, %v2645_v60  ;;  %2939 = vmatmul.mubr.msk.f32.vlgmr.msra.gmra.mxu0 %vm60_vm0, %v2645_v60 }
 0xda0   :  { %v2721_v24 = vpop.f32.mrf.mxu1  ;;  %v2792_v25 = vpop.f32.mrf.mxu0 }
 0xda1   :  { %v2722_v27 = vadd.f32 %v2721_v24, %v2650_v59  ;;  %v2793_v29 = vadd.f32 %v2792_v25, %v2650_v59 }
 0xda2   :  { %v2723_v34 = vpop.f32.mrf.mxu1  ;;  %v2794_v35 = vpop.f32.mrf.mxu0 }
 0xda3   :  { %v2819_v36 = vmul.f32 %v2802_v11, %v2722_v27  ;;  %v2821_v37 = vmul.f32 %v2810_v23, %v2793_v29  ;;  %v2724_v38 = vadd.f32 %v2723_v34, %v2650_v59  ;;  %v2795_v39 = vadd.f32 %v2794_v35, %v2650_v59 }
 0xda5   :  { %2823 = vst [vmem:[%s4115_s14] sm:$0x1f] %v2819_v36  ;;  %2825 = vst [vmem:[%s4115_s14 + $0x10] sm:$0x1f] %v2821_v37  ;;  %v2820_v10 = vmul.f32 %v2806_v32, %v2724_v38  ;;  %v2822_v2 = vmul.f32 %v2814_v33, %v2795_v39 }
 0xda7   :  { %2824 = vst [vmem:[%s4115_s14 + $0x8] sm:$0x1f] %v2820_v10  ;;  %2826 = vst [vmem:[%s4115_s14 + $0x18] sm:$0x1f] %v2822_v2 }

</bundles_post_ra>
